<compile_context>
chip_gen: v7x
topology: tpu7x:2x2x1
jax: 0.10.0
libtpu: 0.0.40
codegen_flags: <defaults>
</compile_context>

<pallas_src>
import functools

import jax
import jax.numpy as jnp
from jax import lax
from jax.experimental import pallas as pl
from jax.experimental.pallas import tpu as pltpu

N, C, H, W = 2, 4, 16, 16
COUT = 8
KH = KW = 3
NUM_CLASSES = 10
HW = H * W
NC = N * C


# ---------------------------------------------------------------------------
# Fused kernel: [normalize] -> conv3x3(pad=1) -> +bias -> ReLU -> GAP -> linear
# ---------------------------------------------------------------------------
def _fused_kernel(apply_aug, x_ref, mean_ref, inv_std_ref, wconv_ref, cb_ref,
                  lin_ref, lb_ref, o_ref):
    x = x_ref[...]                                            # (N*C, H*W)
    if apply_aug:
        # aug: per-channel normalize; inv_std precomputed on host -> multiply, no divide.
        x = (x - mean_ref[...]) * inv_std_ref[...]

    # In-VMEM im2col.  For tap (kh, kw) with offsets (a, b) = (kh-1, kw-1):
    #   shifted[:, p] = x[:, p + a*W + b]   (zero where the 3x3 window leaves the image)
    # expressed as x @ sel  with sel[q, p] = [q == p + a*W + b]; the out-of-range flat
    # index handles the row (h) border, a cheap per-lane mask handles the column (w) border.
    src = lax.broadcasted_iota(jnp.int32, (HW, HW), 0)        # source flat index q
    dst = lax.broadcasted_iota(jnp.int32, (HW, HW), 1)        # destination flat index p
    diff = src - dst                                          # q - p
    w_dst = lax.broadcasted_iota(jnp.int32, (1, HW), 1) % W   # destination column w

    acc = jnp.zeros((N * COUT, HW), dtype=jnp.float32)
    for kh in range(KH):
        for kw in range(KW):
            a, b = kh - 1, kw - 1
            sel = (diff == (a * W + b)).astype(jnp.float32)   # (HW, HW) 0/1 shift matrix
            shifted = jnp.dot(x, sel, preferred_element_type=jnp.float32)   # (N*C, HW)
            if b > 0:
                shifted = jnp.where(w_dst < W - b, shifted, 0.0)
            elif b < 0:
                shifted = jnp.where(w_dst >= -b, shifted, 0.0)
            # Block-diagonal (over batch) conv weights for this tap: (N*COUT, N*C).
            acc = acc + jnp.dot(wconv_ref[kh * KW + kw], shifted,
                                preferred_element_type=jnp.float32)         # (N*COUT, HW)

    h = jnp.maximum(acc + cb_ref[...], 0.0)                   # bias + ReLU, lane-dense

    # Global average pool as a matmul (no cross-sublane reshape / reduction).
    pool = jnp.full((HW, 1), 1.0 / HW, dtype=jnp.float32)
    pooled = jnp.dot(h, pool, preferred_element_type=jnp.float32)           # (N*COUT, 1)

    # Pooled column -> flat (n, class) logits column via block-diagonal linear weights.
    logits = jnp.dot(lin_ref[...], pooled,
                     preferred_element_type=jnp.float32) + lb_ref[...]      # (N*CLS, 1)
    o_ref[...] = logits.astype(o_ref.dtype)


# ---------------------------------------------------------------------------
# One-time host-side parameter packing (exact, broadcast-multiply only)
# ---------------------------------------------------------------------------
def pack_params(params):
    eye_n = jnp.eye(N, dtype=jnp.float32)

    # conv_w (COUT, C, KH, KW) -> per-tap block-diagonal matrices (KH*KW, N*COUT, N*C)
    wtap = params["conv_w"].transpose(2, 3, 0, 1).reshape(KH * KW, COUT, C)   # [tap, co, c]
    wconv = (wtap[:, None, :, None, :] * eye_n[None, :, None, :, None]
             ).reshape(KH * KW, N * COUT, N * C)

    cb = jnp.tile(params["conv_b"], N).reshape(N * COUT, 1)

    # lin_w (COUT, CLS) -> block-diagonal (N*CLS, N*COUT): pooled column -> logits column
    lin = (params["lin_w"].T[None, :, None, :] * eye_n[:, None, :, None]
           ).reshape(N * NUM_CLASSES, N * COUT)
    lb = jnp.tile(params["lin_b"], N).reshape(N * NUM_CLASSES, 1)

    mean = jnp.tile(params["aug_mean"], N).reshape(N * C, 1)
    inv_std = jnp.tile(1.0 / params["aug_std"], N).reshape(N * C, 1)

    return {"wconv": wconv.astype(jnp.float32), "cb": cb.astype(jnp.float32),
            "lin": lin.astype(jnp.float32), "lb": lb.astype(jnp.float32),
            "mean": mean.astype(jnp.float32), "inv_std": inv_std.astype(jnp.float32)}


# ---------------------------------------------------------------------------
# AugModel.forward equivalent
# ---------------------------------------------------------------------------
@functools.partial(jax.jit, static_argnames=("training",))
def aug_model_forward(x, packed, training=False):
    # Mirrors AugModel.forward: model(aug(x)) when the inner model is training, else model(x).
    x2 = x.reshape(N * C, H * W)              # contiguous reshape, no data movement
    vmem = pl.BlockSpec(memory_space=pltpu.MemorySpace.VMEM)
    out = pl.pallas_call(
        functools.partial(_fused_kernel, training),
        out_shape=jax.ShapeDtypeStruct((N * NUM_CLASSES, 1), jnp.float32),
        in_specs=[vmem] * 7,
        out_specs=vmem,
        # TODO(synk): at these toy shapes a grid-less single-TC launch is optimal; for
        # larger N/H*W, tile a grid over the batch/row dim with
        # dimension_semantics=("parallel",) so both v7x TensorCores are used, and cast
        # matmul operands to bf16 on v6e/v7x.
    )(x2, packed["mean"], packed["inv_std"], packed["wconv"], packed["cb"],
      packed["lin"], packed["lb"])
    return out.reshape(N, NUM_CLASSES)        # contiguous reshape of 20 elements


# ---------------------------------------------------------------------------
# Pure-JAX reference (for correctness check only)
# ---------------------------------------------------------------------------
def _reference_forward(x, params, training):
    xa = x
    if training:
        xa = (x - params["aug_mean"][None, :, None, None]) \
             / params["aug_std"][None, :, None, None]
    y = lax.conv_general_dilated(
        xa, params["conv_w"], window_strides=(1, 1), padding=((1, 1), (1, 1)),
        dimension_numbers=("NCHW", "OIHW", "NCHW"), precision=lax.Precision.HIGHEST)
    y = jnp.maximum(y + params["conv_b"][None, :, None, None], 0.0)
    pooled = jnp.mean(y, axis=(2, 3))
    return jnp.matmul(pooled, params["lin_w"],
                      precision=lax.Precision.HIGHEST) + params["lin_b"]


if __name__ == "__main__":
    key = jax.random.PRNGKey(0)
    k_x, k_cw, k_cb, k_lw, k_lb = jax.random.split(key, 5)

    x = jax.random.normal(k_x, (N, C, H, W), dtype=jnp.float32)

    params = {
        # augmentation statistics (per input channel)
        "aug_mean": jnp.array([0.1, -0.2, 0.05, 0.0], dtype=jnp.float32),
        "aug_std": jnp.array([1.0, 0.9, 1.1, 1.2], dtype=jnp.float32),
        # Conv2d(C, COUT, 3, padding=1)
        "conv_w": 0.1 * jax.random.normal(k_cw, (COUT, C, KH, KW), dtype=jnp.float32),
        "conv_b": 0.1 * jax.random.normal(k_cb, (COUT,), dtype=jnp.float32),
        # Linear(COUT, NUM_CLASSES)
        "lin_w": 0.1 * jax.random.normal(k_lw, (COUT, NUM_CLASSES), dtype=jnp.float32),
        "lin_b": 0.1 * jax.random.normal(k_lb, (NUM_CLASSES,), dtype=jnp.float32),
    }

    packed = pack_params(params)

    # eval path (self.model.training == False): model(x) only
    out_eval = aug_model_forward(x, packed, training=False)
    # training path: model(aug(x))
    out_train = aug_model_forward(x, packed, training=True)
    jax.block_until_ready((out_eval, out_train))

    assert out_eval.shape == (N, NUM_CLASSES)
    assert out_train.shape == (N, NUM_CLASSES)

    ref_eval = _reference_forward(x, params, training=False)
    ref_train = _reference_forward(x, params, training=True)
    assert jnp.allclose(out_eval, ref_eval, atol=1e-3, rtol=1e-3)
    assert jnp.allclose(out_train, ref_train, atol=1e-3, rtol=1e-3)

    print("KERNEL_OK")
</pallas_src>

<mosaic_0001>
module attributes {stable_mosaic.version = 11 : i64} {
  func.func @_fused_kernel(%arg0: memref<8x256xf32, #tpu.memory_space<vmem>>, %arg1: memref<8x1xf32, #tpu.memory_space<vmem>>, %arg2: memref<8x1xf32, #tpu.memory_space<vmem>>, %arg3: memref<9x16x8xf32, #tpu.memory_space<vmem>>, %arg4: memref<16x1xf32, #tpu.memory_space<vmem>>, %arg5: memref<20x16xf32, #tpu.memory_space<vmem>>, %arg6: memref<20x1xf32, #tpu.memory_space<vmem>>, %arg7: memref<20x1xf32, #tpu.memory_space<vmem>>) attributes {dimension_semantics = [], scalar_prefetch = 0 : i64, scratch_operands = 0 : i64, tpu.core_type = #tpu.core_type<tc>} {
    %c0 = arith.constant 0 : index
    %c0_0 = arith.constant 0 : index
    %0 = vector.load %arg0[%c0, %c0_0] : memref<8x256xf32, #tpu.memory_space<vmem>>, vector<8x256xf32>
    %1 = tpu.iota {dimensions = array<i32: 0>} : vector<256x256xi32>
    %2 = tpu.iota {dimensions = array<i32: 1>} : vector<256x256xi32>
    %3 = arith.subi %1, %2 : vector<256x256xi32>
    %4 = tpu.iota {dimensions = array<i32: 1>} : vector<1x256xi32>
    %c16_i32 = arith.constant 16 : i32
    %c0_i32 = arith.constant 0 : i32
    %5 = arith.cmpi eq, %c16_i32, %c0_i32 : i32
    %c1_i32 = arith.constant 1 : i32
    %6 = arith.select %5, %c1_i32, %c16_i32 : i32
    %7 = vector.broadcast %6 : i32 to vector<1x256xi32>
    %8 = arith.remsi %4, %7 : vector<1x256xi32>
    %c0_i32_1 = arith.constant 0 : i32
    %9 = vector.broadcast %c0_i32_1 : i32 to vector<1x256xi32>
    %10 = arith.cmpi ne, %8, %9 : vector<1x256xi32>
    %c0_i32_2 = arith.constant 0 : i32
    %11 = vector.broadcast %c0_i32_2 : i32 to vector<1x256xi32>
    %12 = arith.cmpi slt, %8, %11 : vector<1x256xi32>
    %c0_i32_3 = arith.constant 0 : i32
    %13 = arith.cmpi slt, %6, %c0_i32_3 : i32
    %14 = vector.broadcast %13 : i1 to vector<1x256xi1>
    %15 = vector.broadcast %14 : vector<1x256xi1> to vector<1x256xi1>
    %16 = arith.xori %12, %15 : vector<1x256xi1>
    %17 = arith.andi %16, %10 : vector<1x256xi1>
    %18 = vector.broadcast %6 : i32 to vector<1x256xi32>
    %19 = arith.addi %8, %18 : vector<1x256xi32>
    %20 = arith.select %17, %19, %8 : vector<1x256xi1>, vector<1x256xi32>
    %cst = arith.constant 0.000000e+00 : f32
    %21 = vector.broadcast %cst : f32 to vector<16x256xf32>
    %c-17_i32 = arith.constant -17 : i32
    %22 = vector.broadcast %c-17_i32 : i32 to vector<256x256xi32>
    %23 = arith.cmpi eq, %3, %22 : vector<256x256xi32>
    %24 = arith.extui %23 : vector<256x256xi1> to vector<256x256xi32>
    %25 = arith.sitofp %24 : vector<256x256xi32> to vector<256x256xf32>
    %cst_4 = arith.constant dense<0.000000e+00> : vector<8x256xf32>
    %26 = tpu.matmul %0, %25, %cst_4 {dimension_numbers = #tpu.dot_dimension_numbers<[1], [0], [0], [1], [0, 0, 1, 1], [], []>} : vector<8x256xf32>, vector<256x256xf32>, vector<8x256xf32> -> vector<8x256xf32>
    %c1_i32_5 = arith.constant 1 : i32
    %27 = vector.broadcast %c1_i32_5 : i32 to vector<1x256xi32>
    %28 = arith.cmpi sge, %20, %27 : vector<1x256xi32>
    %cst_6 = arith.constant 0.000000e+00 : f32
    %29 = vector.shape_cast %28 : vector<1x256xi1> to vector<1x256xi1>
    %30 = vector.broadcast %29 : vector<1x256xi1> to vector<8x256xi1>
    %31 = vector.broadcast %cst_6 : f32 to vector<8x256xf32>
    %32 = arith.select %30, %26, %31 : vector<8x256xi1>, vector<8x256xf32>
    %c0_7 = arith.constant 0 : index
    %c0_8 = arith.constant 0 : index
    %c0_9 = arith.constant 0 : index
    %33 = vector.load %arg3[%c0_7, %c0_8, %c0_9] : memref<9x16x8xf32, #tpu.memory_space<vmem>>, vector<1x16x8xf32>
    %34 = vector.shape_cast %33 : vector<1x16x8xf32> to vector<16x8xf32>
    %cst_10 = arith.constant dense<0.000000e+00> : vector<16x256xf32>
    %35 = tpu.matmul %34, %32, %cst_10 {dimension_numbers = #tpu.dot_dimension_numbers<[1], [0], [0], [1], [0, 0, 1, 1], [], []>} : vector<16x8xf32>, vector<8x256xf32>, vector<16x256xf32> -> vector<16x256xf32>
    %36 = arith.addf %21, %35 : vector<16x256xf32>
    %c-16_i32 = arith.constant -16 : i32
    %37 = vector.broadcast %c-16_i32 : i32 to vector<256x256xi32>
    %38 = arith.cmpi eq, %3, %37 : vector<256x256xi32>
    %39 = arith.extui %38 : vector<256x256xi1> to vector<256x256xi32>
    %40 = arith.sitofp %39 : vector<256x256xi32> to vector<256x256xf32>
    %cst_11 = arith.constant dense<0.000000e+00> : vector<8x256xf32>
    %41 = tpu.matmul %0, %40, %cst_11 {dimension_numbers = #tpu.dot_dimension_numbers<[1], [0], [0], [1], [0, 0, 1, 1], [], []>} : vector<8x256xf32>, vector<256x256xf32>, vector<8x256xf32> -> vector<8x256xf32>
    %c1 = arith.constant 1 : index
    %c0_12 = arith.constant 0 : index
    %c0_13 = arith.constant 0 : index
    %42 = vector.load %arg3[%c1, %c0_12, %c0_13] : memref<9x16x8xf32, #tpu.memory_space<vmem>>, vector<1x16x8xf32>
    %43 = vector.shape_cast %42 : vector<1x16x8xf32> to vector<16x8xf32>
    %cst_14 = arith.constant dense<0.000000e+00> : vector<16x256xf32>
    %44 = tpu.matmul %43, %41, %cst_14 {dimension_numbers = #tpu.dot_dimension_numbers<[1], [0], [0], [1], [0, 0, 1, 1], [], []>} : vector<16x8xf32>, vector<8x256xf32>, vector<16x256xf32> -> vector<16x256xf32>
    %45 = arith.addf %36, %44 : vector<16x256xf32>
    %c-15_i32 = arith.constant -15 : i32
    %46 = vector.broadcast %c-15_i32 : i32 to vector<256x256xi32>
    %47 = arith.cmpi eq, %3, %46 : vector<256x256xi32>
    %48 = arith.extui %47 : vector<256x256xi1> to vector<256x256xi32>
    %49 = arith.sitofp %48 : vector<256x256xi32> to vector<256x256xf32>
    %cst_15 = arith.constant dense<0.000000e+00> : vector<8x256xf32>
    %50 = tpu.matmul %0, %49, %cst_15 {dimension_numbers = #tpu.dot_dimension_numbers<[1], [0], [0], [1], [0, 0, 1, 1], [], []>} : vector<8x256xf32>, vector<256x256xf32>, vector<8x256xf32> -> vector<8x256xf32>
    %c15_i32 = arith.constant 15 : i32
    %51 = vector.broadcast %c15_i32 : i32 to vector<1x256xi32>
    %52 = arith.cmpi slt, %20, %51 : vector<1x256xi32>
    %cst_16 = arith.constant 0.000000e+00 : f32
    %53 = vector.shape_cast %52 : vector<1x256xi1> to vector<1x256xi1>
    %54 = vector.broadcast %53 : vector<1x256xi1> to vector<8x256xi1>
    %55 = vector.broadcast %cst_16 : f32 to vector<8x256xf32>
    %56 = arith.select %54, %50, %55 : vector<8x256xi1>, vector<8x256xf32>
    %c2 = arith.constant 2 : index
    %c0_17 = arith.constant 0 : index
    %c0_18 = arith.constant 0 : index
    %57 = vector.load %arg3[%c2, %c0_17, %c0_18] : memref<9x16x8xf32, #tpu.memory_space<vmem>>, vector<1x16x8xf32>
    %58 = vector.shape_cast %57 : vector<1x16x8xf32> to vector<16x8xf32>
    %cst_19 = arith.constant dense<0.000000e+00> : vector<16x256xf32>
    %59 = tpu.matmul %58, %56, %cst_19 {dimension_numbers = #tpu.dot_dimension_numbers<[1], [0], [0], [1], [0, 0, 1, 1], [], []>} : vector<16x8xf32>, vector<8x256xf32>, vector<16x256xf32> -> vector<16x256xf32>
    %60 = arith.addf %45, %59 : vector<16x256xf32>
    %c-1_i32 = arith.constant -1 : i32
    %61 = vector.broadcast %c-1_i32 : i32 to vector<256x256xi32>
    %62 = arith.cmpi eq, %3, %61 : vector<256x256xi32>
    %63 = arith.extui %62 : vector<256x256xi1> to vector<256x256xi32>
    %64 = arith.sitofp %63 : vector<256x256xi32> to vector<256x256xf32>
    %cst_20 = arith.constant dense<0.000000e+00> : vector<8x256xf32>
    %65 = tpu.matmul %0, %64, %cst_20 {dimension_numbers = #tpu.dot_dimension_numbers<[1], [0], [0], [1], [0, 0, 1, 1], [], []>} : vector<8x256xf32>, vector<256x256xf32>, vector<8x256xf32> -> vector<8x256xf32>
    %c1_i32_21 = arith.constant 1 : i32
    %66 = vector.broadcast %c1_i32_21 : i32 to vector<1x256xi32>
    %67 = arith.cmpi sge, %20, %66 : vector<1x256xi32>
    %cst_22 = arith.constant 0.000000e+00 : f32
    %68 = vector.shape_cast %67 : vector<1x256xi1> to vector<1x256xi1>
    %69 = vector.broadcast %68 : vector<1x256xi1> to vector<8x256xi1>
    %70 = vector.broadcast %cst_22 : f32 to vector<8x256xf32>
    %71 = arith.select %69, %65, %70 : vector<8x256xi1>, vector<8x256xf32>
    %c3 = arith.constant 3 : index
    %c0_23 = arith.constant 0 : index
    %c0_24 = arith.constant 0 : index
    %72 = vector.load %arg3[%c3, %c0_23, %c0_24] : memref<9x16x8xf32, #tpu.memory_space<vmem>>, vector<1x16x8xf32>
    %73 = vector.shape_cast %72 : vector<1x16x8xf32> to vector<16x8xf32>
    %cst_25 = arith.constant dense<0.000000e+00> : vector<16x256xf32>
    %74 = tpu.matmul %73, %71, %cst_25 {dimension_numbers = #tpu.dot_dimension_numbers<[1], [0], [0], [1], [0, 0, 1, 1], [], []>} : vector<16x8xf32>, vector<8x256xf32>, vector<16x256xf32> -> vector<16x256xf32>
    %75 = arith.addf %60, %74 : vector<16x256xf32>
    %c0_i32_26 = arith.constant 0 : i32
    %76 = vector.broadcast %c0_i32_26 : i32 to vector<256x256xi32>
    %77 = arith.cmpi eq, %3, %76 : vector<256x256xi32>
    %78 = arith.extui %77 : vector<256x256xi1> to vector<256x256xi32>
    %79 = arith.sitofp %78 : vector<256x256xi32> to vector<256x256xf32>
    %cst_27 = arith.constant dense<0.000000e+00> : vector<8x256xf32>
    %80 = tpu.matmul %0, %79, %cst_27 {dimension_numbers = #tpu.dot_dimension_numbers<[1], [0], [0], [1], [0, 0, 1, 1], [], []>} : vector<8x256xf32>, vector<256x256xf32>, vector<8x256xf32> -> vector<8x256xf32>
    %c4 = arith.constant 4 : index
    %c0_28 = arith.constant 0 : index
    %c0_29 = arith.constant 0 : index
    %81 = vector.load %arg3[%c4, %c0_28, %c0_29] : memref<9x16x8xf32, #tpu.memory_space<vmem>>, vector<1x16x8xf32>
    %82 = vector.shape_cast %81 : vector<1x16x8xf32> to vector<16x8xf32>
    %cst_30 = arith.constant dense<0.000000e+00> : vector<16x256xf32>
    %83 = tpu.matmul %82, %80, %cst_30 {dimension_numbers = #tpu.dot_dimension_numbers<[1], [0], [0], [1], [0, 0, 1, 1], [], []>} : vector<16x8xf32>, vector<8x256xf32>, vector<16x256xf32> -> vector<16x256xf32>
    %84 = arith.addf %75, %83 : vector<16x256xf32>
    %c1_i32_31 = arith.constant 1 : i32
    %85 = vector.broadcast %c1_i32_31 : i32 to vector<256x256xi32>
    %86 = arith.cmpi eq, %3, %85 : vector<256x256xi32>
    %87 = arith.extui %86 : vector<256x256xi1> to vector<256x256xi32>
    %88 = arith.sitofp %87 : vector<256x256xi32> to vector<256x256xf32>
    %cst_32 = arith.constant dense<0.000000e+00> : vector<8x256xf32>
    %89 = tpu.matmul %0, %88, %cst_32 {dimension_numbers = #tpu.dot_dimension_numbers<[1], [0], [0], [1], [0, 0, 1, 1], [], []>} : vector<8x256xf32>, vector<256x256xf32>, vector<8x256xf32> -> vector<8x256xf32>
    %c15_i32_33 = arith.constant 15 : i32
    %90 = vector.broadcast %c15_i32_33 : i32 to vector<1x256xi32>
    %91 = arith.cmpi slt, %20, %90 : vector<1x256xi32>
    %cst_34 = arith.constant 0.000000e+00 : f32
    %92 = vector.shape_cast %91 : vector<1x256xi1> to vector<1x256xi1>
    %93 = vector.broadcast %92 : vector<1x256xi1> to vector<8x256xi1>
    %94 = vector.broadcast %cst_34 : f32 to vector<8x256xf32>
    %95 = arith.select %93, %89, %94 : vector<8x256xi1>, vector<8x256xf32>
    %c5 = arith.constant 5 : index
    %c0_35 = arith.constant 0 : index
    %c0_36 = arith.constant 0 : index
    %96 = vector.load %arg3[%c5, %c0_35, %c0_36] : memref<9x16x8xf32, #tpu.memory_space<vmem>>, vector<1x16x8xf32>
    %97 = vector.shape_cast %96 : vector<1x16x8xf32> to vector<16x8xf32>
    %cst_37 = arith.constant dense<0.000000e+00> : vector<16x256xf32>
    %98 = tpu.matmul %97, %95, %cst_37 {dimension_numbers = #tpu.dot_dimension_numbers<[1], [0], [0], [1], [0, 0, 1, 1], [], []>} : vector<16x8xf32>, vector<8x256xf32>, vector<16x256xf32> -> vector<16x256xf32>
    %99 = arith.addf %84, %98 : vector<16x256xf32>
    %c15_i32_38 = arith.constant 15 : i32
    %100 = vector.broadcast %c15_i32_38 : i32 to vector<256x256xi32>
    %101 = arith.cmpi eq, %3, %100 : vector<256x256xi32>
    %102 = arith.extui %101 : vector<256x256xi1> to vector<256x256xi32>
    %103 = arith.sitofp %102 : vector<256x256xi32> to vector<256x256xf32>
    %cst_39 = arith.constant dense<0.000000e+00> : vector<8x256xf32>
    %104 = tpu.matmul %0, %103, %cst_39 {dimension_numbers = #tpu.dot_dimension_numbers<[1], [0], [0], [1], [0, 0, 1, 1], [], []>} : vector<8x256xf32>, vector<256x256xf32>, vector<8x256xf32> -> vector<8x256xf32>
    %c1_i32_40 = arith.constant 1 : i32
    %105 = vector.broadcast %c1_i32_40 : i32 to vector<1x256xi32>
    %106 = arith.cmpi sge, %20, %105 : vector<1x256xi32>
    %cst_41 = arith.constant 0.000000e+00 : f32
    %107 = vector.shape_cast %106 : vector<1x256xi1> to vector<1x256xi1>
    %108 = vector.broadcast %107 : vector<1x256xi1> to vector<8x256xi1>
    %109 = vector.broadcast %cst_41 : f32 to vector<8x256xf32>
    %110 = arith.select %108, %104, %109 : vector<8x256xi1>, vector<8x256xf32>
    %c6 = arith.constant 6 : index
    %c0_42 = arith.constant 0 : index
    %c0_43 = arith.constant 0 : index
    %111 = vector.load %arg3[%c6, %c0_42, %c0_43] : memref<9x16x8xf32, #tpu.memory_space<vmem>>, vector<1x16x8xf32>
    %112 = vector.shape_cast %111 : vector<1x16x8xf32> to vector<16x8xf32>
    %cst_44 = arith.constant dense<0.000000e+00> : vector<16x256xf32>
    %113 = tpu.matmul %112, %110, %cst_44 {dimension_numbers = #tpu.dot_dimension_numbers<[1], [0], [0], [1], [0, 0, 1, 1], [], []>} : vector<16x8xf32>, vector<8x256xf32>, vector<16x256xf32> -> vector<16x256xf32>
    %114 = arith.addf %99, %113 : vector<16x256xf32>
    %c16_i32_45 = arith.constant 16 : i32
    %115 = vector.broadcast %c16_i32_45 : i32 to vector<256x256xi32>
    %116 = arith.cmpi eq, %3, %115 : vector<256x256xi32>
    %117 = arith.extui %116 : vector<256x256xi1> to vector<256x256xi32>
    %118 = arith.sitofp %117 : vector<256x256xi32> to vector<256x256xf32>
    %cst_46 = arith.constant dense<0.000000e+00> : vector<8x256xf32>
    %119 = tpu.matmul %0, %118, %cst_46 {dimension_numbers = #tpu.dot_dimension_numbers<[1], [0], [0], [1], [0, 0, 1, 1], [], []>} : vector<8x256xf32>, vector<256x256xf32>, vector<8x256xf32> -> vector<8x256xf32>
    %c7 = arith.constant 7 : index
    %c0_47 = arith.constant 0 : index
    %c0_48 = arith.constant 0 : index
    %120 = vector.load %arg3[%c7, %c0_47, %c0_48] : memref<9x16x8xf32, #tpu.memory_space<vmem>>, vector<1x16x8xf32>
    %121 = vector.shape_cast %120 : vector<1x16x8xf32> to vector<16x8xf32>
    %cst_49 = arith.constant dense<0.000000e+00> : vector<16x256xf32>
    %122 = tpu.matmul %121, %119, %cst_49 {dimension_numbers = #tpu.dot_dimension_numbers<[1], [0], [0], [1], [0, 0, 1, 1], [], []>} : vector<16x8xf32>, vector<8x256xf32>, vector<16x256xf32> -> vector<16x256xf32>
    %123 = arith.addf %114, %122 : vector<16x256xf32>
    %c17_i32 = arith.constant 17 : i32
    %124 = vector.broadcast %c17_i32 : i32 to vector<256x256xi32>
    %125 = arith.cmpi eq, %3, %124 : vector<256x256xi32>
    %126 = arith.extui %125 : vector<256x256xi1> to vector<256x256xi32>
    %127 = arith.sitofp %126 : vector<256x256xi32> to vector<256x256xf32>
    %cst_50 = arith.constant dense<0.000000e+00> : vector<8x256xf32>
    %128 = tpu.matmul %0, %127, %cst_50 {dimension_numbers = #tpu.dot_dimension_numbers<[1], [0], [0], [1], [0, 0, 1, 1], [], []>} : vector<8x256xf32>, vector<256x256xf32>, vector<8x256xf32> -> vector<8x256xf32>
    %c15_i32_51 = arith.constant 15 : i32
    %129 = vector.broadcast %c15_i32_51 : i32 to vector<1x256xi32>
    %130 = arith.cmpi slt, %20, %129 : vector<1x256xi32>
    %cst_52 = arith.constant 0.000000e+00 : f32
    %131 = vector.shape_cast %130 : vector<1x256xi1> to vector<1x256xi1>
    %132 = vector.broadcast %131 : vector<1x256xi1> to vector<8x256xi1>
    %133 = vector.broadcast %cst_52 : f32 to vector<8x256xf32>
    %134 = arith.select %132, %128, %133 : vector<8x256xi1>, vector<8x256xf32>
    %c8 = arith.constant 8 : index
    %c0_53 = arith.constant 0 : index
    %c0_54 = arith.constant 0 : index
    %135 = vector.load %arg3[%c8, %c0_53, %c0_54] : memref<9x16x8xf32, #tpu.memory_space<vmem>>, vector<1x16x8xf32>
    %136 = vector.shape_cast %135 : vector<1x16x8xf32> to vector<16x8xf32>
    %cst_55 = arith.constant dense<0.000000e+00> : vector<16x256xf32>
    %137 = tpu.matmul %136, %134, %cst_55 {dimension_numbers = #tpu.dot_dimension_numbers<[1], [0], [0], [1], [0, 0, 1, 1], [], []>} : vector<16x8xf32>, vector<8x256xf32>, vector<16x256xf32> -> vector<16x256xf32>
    %138 = arith.addf %123, %137 : vector<16x256xf32>
    %c0_56 = arith.constant 0 : index
    %c0_57 = arith.constant 0 : index
    %139 = vector.load %arg4[%c0_56, %c0_57] : memref<16x1xf32, #tpu.memory_space<vmem>>, vector<16x1xf32>
    %140 = vector.broadcast %139 : vector<16x1xf32> to vector<16x256xf32>
    %141 = arith.addf %138, %140 : vector<16x256xf32>
    %cst_58 = arith.constant 0.000000e+00 : f32
    %142 = vector.broadcast %cst_58 : f32 to vector<16x256xf32>
    %143 = arith.maximumf %141, %142 : vector<16x256xf32>
    %cst_59 = arith.constant 3.906250e-03 : f32
    %144 = vector.broadcast %cst_59 : f32 to vector<256x1xf32>
    %cst_60 = arith.constant dense<0.000000e+00> : vector<16x1xf32>
    %145 = tpu.matmul %143, %144, %cst_60 {dimension_numbers = #tpu.dot_dimension_numbers<[1], [0], [0], [1], [0, 0, 1, 1], [], []>} : vector<16x256xf32>, vector<256x1xf32>, vector<16x1xf32> -> vector<16x1xf32>
    %c0_61 = arith.constant 0 : index
    %c0_62 = arith.constant 0 : index
    %146 = vector.load %arg5[%c0_61, %c0_62] : memref<20x16xf32, #tpu.memory_space<vmem>>, vector<20x16xf32>
    %cst_63 = arith.constant dense<0.000000e+00> : vector<20x1xf32>
    %147 = tpu.matmul %146, %145, %cst_63 {dimension_numbers = #tpu.dot_dimension_numbers<[1], [0], [0], [1], [0, 0, 1, 1], [], []>} : vector<20x16xf32>, vector<16x1xf32>, vector<20x1xf32> -> vector<20x1xf32>
    %c0_64 = arith.constant 0 : index
    %c0_65 = arith.constant 0 : index
    %148 = vector.load %arg6[%c0_64, %c0_65] : memref<20x1xf32, #tpu.memory_space<vmem>>, vector<20x1xf32>
    %149 = arith.addf %147, %148 : vector<20x1xf32>
    %c0_66 = arith.constant 0 : index
    %c0_67 = arith.constant 0 : index
    %150 = vector.load %arg7[%c0_66, %c0_67] : memref<20x1xf32, #tpu.memory_space<vmem>>, vector<20x1xf32>
    tpu.vector_store %arg7[%c0_66, %c0_67], %149 {strides = array<i32>} : memref<20x1xf32, #tpu.memory_space<vmem>>, vector<20x1xf32>,
    return
  }
}

</mosaic_0001>

<bundles_post_ra>
// kernel: aug_model_forward.1
= control target key start
LH: loop header
LB: loop body
LE: loop exit
PB: predicated region body
PF: predicated region fallthrough
CT: control target
= control target key end

     0   :  { %v28_v0 = vlaneseq  ;;  %v4714_v1 = vmov 0.0|0.0   ;;  %v4715_v18 = vmov 1.0|1.0   ;;  %v4716_v44 = vmov 1.0   ;;  %s5778_s1 = inlined_call_operand.vmem [shape: f32[8,1], index: 1, kind: input, shape index: {}]   ;;  %s5779_s2 = inlined_call_operand.vmem [shape: f32[8,1], index: 2, kind: input, shape index: {}]   ;;  %s5780_s0 = inlined_call_operand.vmem [shape: f32[8,256], index: 0, kind: input, shape index: {}]   ;;  %s5781_s3 = inlined_call_operand.vmem [shape: f32[9,16,8], index: 3, kind: input, shape index: {}]   ;;  %s5782_s4 = inlined_call_operand.vmem [shape: f32[16,1], index: 4, kind: input, shape index: {}]   ;;  %s5783_s5 = inlined_call_operand.vmem [shape: f32[20,16], index: 5, kind: input, shape index: {}]   ;;  %s5784_s6 = inlined_call_operand.vmem [shape: f32[20,1], index: 6, kind: input, shape index: {}]   ;;  %s5785_s7 = inlined_call_operand.vmem [shape: f32[20,1], index: 7, kind: output, shape index: {}]  }
   0x1   :  { %4218 = vmatprep.subr.bf16.mxu0 %v4714_v1  ;;  %4265 = vmatprep.subr.bf16.mxu1 %v4714_v1  ;;  %v4767_v2 = vld [vmem:[%s5780_s0 + $0x8] sm:$0xff]  ;;  %v4717_v45 = vmov 0.0   ;;  %v423_v43 = vld [vmem:[%s5781_s3] sm:$0xff] }
   0x2   :  { %v4769_v3 = vshrl.u32 %v28_v0, 7  ;;  %v4771_v4 = vand.u32 127, %v28_v0  ;;  %408 = vmatprep.mubr.f32.mxu0 %v4767_v2  ;;  %681 = vmatprep.mubr.f32.mxu1 %v4767_v2  ;;  %v4912_v46 = vpack.c.bf16 %v4716_v44, %v4717_v45 }
   0x4   :  { %v30_v5 = vadd.s32 8, %v4769_v3  ;;  %v4778_v6 = vsub.s32 %v4769_v3, %v4771_v4  ;;  %v31_v7 = vadd.s32 16, %v4769_v3  ;;  %v32_v8 = vadd.s32 24, %v4769_v3 }
   0x5   :  { %v33_v9 = vadd.s32 32, %v4769_v3  ;;  %v34_v10 = vadd.s32 40, %v4769_v3  ;;  %v35_v13 = vadd.s32 48, %v4769_v3  ;;  %v36_v16 = vadd.s32 56, %v4769_v3 }
   0x6   :  { %v4785_v11 = vsub.s32 %v30_v5, %v4771_v4  ;;  %vm152_vm0 = vcmp.eq.s32.totalorder %v4778_v6, 4294967279  ;;  %v4789_v12 = vsub.s32 %v31_v7, %v4771_v4  ;;  %vm425_vm1 = vcmp.eq.s32.totalorder %v4778_v6, 4294967280 }
   0x7   :  { %v4794_v14 = vsub.s32 %v32_v8, %v4771_v4  ;;  %v4797_v15 = vsub.s32 %v33_v9, %v4771_v4  ;;  %v4804_v17 = vsub.s32 %v34_v10, %v4771_v4  ;;  %v4814_v19 = vsub.s32 %v35_v13, %v4771_v4 }
   0x8   :  { %vm154_vm2 = vcmp.eq.s32.totalorder %v4785_v11, 4294967279  ;;  %vm427_vm3 = vcmp.eq.s32.totalorder %v4785_v11, 4294967280  ;;  %vm156_vm4 = vcmp.eq.s32.totalorder %v4789_v12, 4294967279  ;;  %vm429_vm7 = vcmp.eq.s32.totalorder %v4789_v12, 4294967280 }
   0x9   :  { %vm4219_vm5 = vmpackc.low %vm154_vm2, %vm152_vm0  ;;  %vm158_vm6 = vcmp.eq.s32.totalorder %v4794_v14, 4294967279  ;;  %vm431_vm8 = vcmp.eq.s32.totalorder %v4794_v14, 4294967280  ;;  %vm160_vm11 = vcmp.eq.s32.totalorder %v4797_v15, 4294967279  ;;  %vm162_vm13 = vcmp.eq.s32.totalorder %v4804_v17, 4294967279 }
   0xa   :  { %4220 = vmatpush1.bf16.msk.msra.mxu0 %vm4219_vm5, %v4715_v18  ;;  %vm4266_vm9 = vmpackc.low %vm427_vm3, %vm425_vm1  ;;  %v4819_v20 = vsub.s32 %v36_v16, %v4771_v4  ;;  %v37_v21 = vadd.s32 64, %v4769_v3  ;;  %v38_v22 = vadd.s32 72, %v4769_v3  ;;  %vm433_vm14 = vcmp.eq.s32.totalorder %v4797_v15, 4294967280 }
   0xb   :  { %4267 = vmatpush1.bf16.msk.msra.mxu1 %vm4266_vm9, %v4715_v18  ;;  %4221 = vmatprep.subr.bf16.mxu0 %v4714_v1  ;;  %vm4222_vm10 = vmpackc.low %vm158_vm6, %vm156_vm4  ;;  %vm435_vm15 = vcmp.eq.s32.totalorder %v4804_v17, 4294967280  ;;  %v39_v23 = vadd.s32 80, %v4769_v3  ;;  %v40_v24 = vadd.s32 88, %v4769_v3  ;;  %vm164_vm2 = vcmp.eq.s32.totalorder %v4814_v19, 4294967279 }
   0xc   :  { %4268 = vmatprep.subr.bf16.mxu1 %v4714_v1  ;;  %vm4269_vm12 = vmpackc.low %vm431_vm8, %vm429_vm7  ;;  %vm166_vm3 = vcmp.eq.s32.totalorder %v4819_v20, 4294967279  ;;  %v4834_v25 = vsub.s32 %v37_v21, %v4771_v4  ;;  %v4837_v26 = vsub.s32 %v38_v22, %v4771_v4  ;;  %vm437_vm4 = vcmp.eq.s32.totalorder %v4814_v19, 4294967280  ;;  %v5057_v22 = vld [vmem:[%s5780_s0] sm:$0xff] }
   0xd   :  { %vm4225_vm0 = vmpackc.low %vm162_vm13, %vm160_vm11  ;;  %vm439_vm5 = vcmp.eq.s32.totalorder %v4819_v20, 4294967280  ;;  %v42_v27 = vadd.s32 104, %v4769_v3  ;;  %v4843_v28 = vadd.s32 128, %v4771_v4  ;;  %v4849_v29 = vsub.s32 %v39_v23, %v4771_v4 }
   0xe   :  { %4223 = vmatpush1.bf16.msk.msra.mxu0 %vm4222_vm10, %v4715_v18  ;;  %vm4272_vm1 = vmpackc.low %vm435_vm15, %vm433_vm14  ;;  %v4852_v30 = vsub.s32 %v40_v24, %v4771_v4  ;;  %v41_v31 = vadd.s32 96, %v4769_v3  ;;  %vm168_vm8 = vcmp.eq.s32.totalorder %v4834_v25, 4294967279  ;;  %vm170_vm9 = vcmp.eq.s32.totalorder %v4837_v26, 4294967279 }
   0xf   :  { %4270 = vmatpush1.bf16.msk.msra.mxu1 %vm4269_vm12, %v4715_v18  ;;  %4224 = vmatprep.subr.bf16.mxu0 %v4714_v1  ;;  %vm4228_vm6 = vmpackc.low %vm166_vm3, %vm164_vm2  ;;  %v4859_v32 = vadd.s32 112, %v4769_v3  ;;  %vm441_vm10 = vcmp.eq.s32.totalorder %v4834_v25, 4294967280  ;;  %vm443_vm11 = vcmp.eq.s32.totalorder %v4837_v26, 4294967280  ;;  %v91_v33 = vsub.s32 %v42_v27, %v4843_v28 }
  0x10   :  { %4271 = vmatprep.subr.bf16.mxu1 %v4714_v1  ;;  %vm4275_vm7 = vmpackc.low %vm439_vm5, %vm437_vm4  ;;  %v4865_v34 = vadd.s32 120, %v4769_v3  ;;  %vm172_vm13 = vcmp.eq.s32.totalorder %v4849_v29, 4294967279  ;;  %vm174_vm14 = vcmp.eq.s32.totalorder %v4852_v30, 4294967279  ;;  %v4873_v35 = vsub.s32 %v42_v27, %v4771_v4 }
  0x11   :  { %vm4231_vm12 = vmpackc.low %vm170_vm9, %vm168_vm8  ;;  %v4876_v36 = vsub.s32 %v41_v31, %v4771_v4  ;;  %v4883_v37 = vsub.s32 %v4859_v32, %v4843_v28  ;;  %v4886_v38 = vadd.s32 128, %v4769_v3  ;;  %vm4888_vm2 = vcmp.eq.s32.totalorder %v91_v33, 4294967279 }
  0x12   :  { %4226 = vmatpush1.bf16.msk.msra.mxu0 %vm4225_vm0, %v4715_v18  ;;  %vm4278_vm15 = vmpackc.low %vm443_vm11, %vm441_vm10  ;;  %vm445_vm0 = vcmp.eq.s32.totalorder %v4849_v29, 4294967280  ;;  %v4894_v40 = vsub.s32 %v4865_v34, %v4843_v28  ;;  %v4897_v41 = vadd.s32 136, %v4769_v3  ;;  %vm451_vm10 = vcmp.eq.s32.totalorder %v4873_v35, 4294967280 }
  0x13   :  { %4273 = vmatpush1.bf16.msk.msra.mxu1 %vm4272_vm1, %v4715_v18  ;;  %4227 = vmatprep.subr.bf16.mxu0 %v4714_v1  ;;  %vm447_vm1 = vcmp.eq.s32.totalorder %v4852_v30, 4294967280  ;;  %vm4900_vm3 = vmpackc.low %vm174_vm14, %vm172_vm13  ;;  %vm176_vm5 = vcmp.eq.s32.totalorder %v4876_v36, 4294967279  ;;  %vm449_vm9 = vcmp.eq.s32.totalorder %v4876_v36, 4294967280  ;;  %vm181_vm11 = vcmp.eq.s32.totalorder %v4883_v37, 4294967279 }
  0x14   :  { %4274 = vmatprep.subr.bf16.mxu1 %v4714_v1  ;;  %vm4906_vm4 = vmpackc.low %vm447_vm1, %vm445_vm0  ;;  %v4925_v47 = vsub.s32 %v4886_v38, %v4843_v28  ;;  %v4930_v48 = vsub.s32 %v4897_v41, %v4843_v28  ;;  %v4933_v49 = vadd.s32 144, %v4769_v3  ;;  %v48_v50 = vadd.s32 152, %v4769_v3 }
  0x15   :  { %vm454_vm14 = vcmp.eq.s32.totalorder %v4883_v37, 4294967280  ;;  %vm4284_vm0 = vmpackc.low %vm451_vm10, %vm449_vm9  ;;  %v49_v51 = vadd.s32 160, %v4769_v3  ;;  %v50_v52 = vadd.s32 168, %v4769_v3  ;;  %v51_v57 = vadd.s32 176, %v4769_v3 }
  0x16   :  { %4229 = vmatpush1.bf16.msk.msra.mxu0 %vm4228_vm6, %v4715_v18  ;;  %vm178_vm6 = vcmp.eq.s32.totalorder %v4873_v35, 4294967279  ;;  %v4952_v53 = vsub.s32 %v4933_v49, %v4843_v28  ;;  %v4955_v54 = vsub.s32 %v48_v50, %v4843_v28  ;;  %v52_v58 = vadd.s32 184, %v4769_v3 }
  0x17   :  { %4276 = vmatpush1.bf16.msk.msra.mxu1 %vm4275_vm7, %v4715_v18  ;;  %4230 = vmatprep.subr.bf16.mxu0 %v4714_v1  ;;  %vm5786_vm7 = vmmov 1   ;;  %vm4239_vm13 = vmpackc.low %vm178_vm6, %vm176_vm5  ;;  %vm187_vm5 = vcmp.eq.s32.totalorder %v4930_v48, 4294967279  ;;  %vm460_vm6 = vcmp.eq.s32.totalorder %v4930_v48, 4294967280  ;;  %v4964_v55 = vsub.s32 %v49_v51, %v4843_v28  ;;  %v3667_v51 = vld [vmem:[%s5781_s3 + $0x10] sm:$0xff] }
  0x18   :  { %4277 = vmatprep.subr.bf16.mxu1 %v4714_v1  ;;  %vm4237_vm8 = vmpackc.low %vm4888_vm2, %vm5786_vm7  ;;  %v4967_v56 = vsub.s32 %v50_v52, %v4843_v28  ;;  %vm189_vm10 = vcmp.eq.s32.totalorder %v4952_v53, 4294967279  ;;  %v53_v59 = vadd.s32 192, %v4769_v3  ;;  %v54_v60 = vadd.s32 200, %v4769_v3  ;;  %v424_v52 = vld [vmem:[%s5781_s3 + $0x8] sm:$0xff] }
  0x19   :  { %v4984_v61 = vsub.s32 %v51_v57, %v4843_v28  ;;  %v4987_v62 = vsub.s32 %v52_v58, %v4843_v28  ;;  %v55_v5 = vadd.s32 208, %v4769_v3  ;;  %v56_v7 = vadd.s32 216, %v4769_v3  ;;  %v3668_v57 = vld [vmem:[%s5781_s3 + $0x18] sm:$0xff] }
  0x1a   :  { %4232 = vmatpush1.bf16.msk.msra.mxu0 %vm4231_vm12, %v4715_v18  ;;  %vm183_vm12 = vcmp.eq.s32.totalorder %v4894_v40, 4294967279  ;;  %v4996_v63 = vsub.s32 %v53_v59, %v4843_v28  ;;  %v4999_v0 = vsub.s32 %v54_v60, %v4843_v28  ;;  %v57_v8 = vadd.s32 224, %v4769_v3 }
  0x1b   :  { %4279 = vmatpush1.bf16.msk.msra.mxu1 %vm4278_vm15, %v4715_v18  ;;  %4233 = vmatprep.subr.bf16.mxu0 %v4714_v1  ;;  %vm456_vm15 = vcmp.eq.s32.totalorder %v4894_v40, 4294967280  ;;  %vm4241_vm1 = vmpackc.low %vm183_vm12, %vm181_vm11  ;;  %vm191_vm11 = vcmp.eq.s32.totalorder %v4955_v54, 4294967279  ;;  %vm462_vm12 = vcmp.eq.s32.totalorder %v4952_v53, 4294967280  ;;  %v58_v9 = vadd.s32 232, %v4769_v3 }
  0x1c   :  { %4280 = vmatprep.subr.bf16.mxu1 %v4714_v1  ;;  %vm4286_vm2 = vmpackc.low %vm456_vm15, %vm454_vm14  ;;  %v5016_v10 = vsub.s32 %v55_v5, %v4843_v28  ;;  %v5019_v13 = vsub.s32 %v56_v7, %v4843_v28  ;;  %v5030_v16 = vsub.s32 %v57_v8, %v4843_v28  ;;  %v139_v23 = vand.u32 15, %v4843_v28 }
  0x1d   :  { %vm4247_vm14 = vmpackc.low %vm191_vm11, %vm189_vm10  ;;  %vm472_vm10 = vcmp.eq.s32.totalorder %v4987_v62, 4294967280  ;;  %v5033_v21 = vsub.s32 %v58_v9, %v4843_v28  ;;  %v132_v24 = vand.u32 15, %v4771_v4  ;;  %v5797_v27 = vmov 0 }
  0x1e   :  { %4235 = vmatpush1.bf16.msk.msra.mxu0 %vm4900_vm3, %v4715_v18  ;;  %vm185_vm3 = vcmp.eq.s32.totalorder %v4925_v47, 4294967279  ;;  %v5799_v33 = vmov 0  ;;  %v5128_v58 = vsub.s32 %v4859_v32, %v4771_v4  ;;  %v5142_v32 = vpack.c.bf16 %v4717_v45, %v4716_v44 }
  0x1f   :  { %4282 = vmatpush1.bf16.msk.msra.mxu1 %vm4906_vm4, %v4715_v18  ;;  %4238 = vmatprep.subr.msk.bf16.mxu0 %vm4237_vm8, %v4912_v46  ;;  %vm458_vm4 = vcmp.eq.s32.totalorder %v4925_v47, 4294967280  ;;  %vm4244_vm8 = vmpackc.low %vm187_vm5, %vm185_vm3  ;;  %vm468_vm3 = vcmp.eq.s32.totalorder %v4967_v56, 4294967280 }
  0x20   :  { %4283 = vmatprep.subr.bf16.mxu1 %v4714_v1  ;;  %vm4289_vm9 = vmpackc.low %vm460_vm6, %vm458_vm4  ;;  %vm197_vm6 = vcmp.eq.s32.totalorder %v4984_v61, 4294967279 }
  0x22   :  { %4240 = vmatpush1.bf16.msk.msra.mxu0 %vm4239_vm13, %v4715_v18  ;;  %vm464_vm13 = vcmp.eq.s32.totalorder %v4955_v54, 4294967280 }
  0x23   :  { %4285 = vmatpush1.bf16.msk.msra.mxu1 %vm4284_vm0, %v4715_v18  ;;  %4242 = vmatprep.subr.msk.bf16.mxu0 %vm4241_vm1, %v4715_v18  ;;  %vm4292_vm15 = vmpackc.low %vm464_vm13, %vm462_vm12  ;;  %vm193_vm0 = vcmp.eq.s32.totalorder %v4964_v55, 4294967279  ;;  %vm195_vm1 = vcmp.eq.s32.totalorder %v4967_v56, 4294967279  ;;  %vm201_vm13 = vcmp.eq.s32.totalorder %v4996_v63, 4294967279 }
  0x24   :  { %4287 = vmatprep.subr.msk.bf16.mxu1 %vm4286_vm2, %v4715_v18  ;;  %vm466_vm2 = vcmp.eq.s32.totalorder %v4964_v55, 4294967280  ;;  %vm4250_vm5 = vmpackc.low %vm195_vm1, %vm193_vm0  ;;  %vm476_vm0 = vcmp.eq.s32.totalorder %v4999_v0, 4294967280 }
  0x25   :  { %vm4295_vm4 = vmpackc.low %vm468_vm3, %vm466_vm2  ;;  %vm205_vm3 = vcmp.eq.s32.totalorder %v5016_v10, 4294967279 }
  0x26   :  { %4243 = vmatpush1.bf16.msra.mxu0 %v4714_v1 }
  0x27   :  { %4288 = vmatpush1.bf16.msra.mxu1 %v4714_v1  ;;  %4245 = vmatprep.subr.msk.bf16.mxu0 %vm4244_vm8, %v4715_v18  ;;  %vm199_vm8 = vcmp.eq.s32.totalorder %v4987_v62, 4294967279 }
  0x28   :  { %4290 = vmatprep.subr.msk.bf16.mxu1 %vm4289_vm9, %v4715_v18  ;;  %vm470_vm9 = vcmp.eq.s32.totalorder %v4984_v61, 4294967280  ;;  %vm4253_vm11 = vmpackc.low %vm199_vm8, %vm197_vm6  ;;  %vm480_vm6 = vcmp.eq.s32.totalorder %v5019_v13, 4294967280 }
  0x29   :  { %vm4298_vm12 = vmpackc.low %vm472_vm10, %vm470_vm9  ;;  %vm209_vm10 = vcmp.eq.s32.totalorder %v5030_v16, 4294967279 }
  0x2a   :  { %4246 = vmatpush1.bf16.msra.mxu0 %v4714_v1 }
  0x2b   :  { %4291 = vmatpush1.bf16.msra.mxu1 %v4714_v1  ;;  %4248 = vmatprep.subr.msk.bf16.mxu0 %vm4247_vm14, %v4715_v18  ;;  %vm203_vm14 = vcmp.eq.s32.totalorder %v4999_v0, 4294967279 }
  0x2c   :  { %4293 = vmatprep.subr.msk.bf16.mxu1 %vm4292_vm15, %v4715_v18  ;;  %vm474_vm15 = vcmp.eq.s32.totalorder %v4996_v63, 4294967280  ;;  %vm4256_vm1 = vmpackc.low %vm203_vm14, %vm201_vm13  ;;  %vm484_vm13 = vcmp.eq.s32.totalorder %v5033_v21, 4294967280 }
  0x2d   :  { %vm4301_vm2 = vmpackc.low %vm476_vm0, %vm474_vm15  ;;  %vm5068_vm0 = vcmp.ge.s32.totalorder %v139_v23, 1 }
  0x2e   :  { %4249 = vmatpush1.bf16.msra.mxu0 %v4714_v1  ;;  %v5798_v27 = vsel %vm5068_vm0, 4294967295, %v5797_v27 }
  0x2f   :  { %4294 = vmatpush1.bf16.msra.mxu1 %v4714_v1  ;;  %4251 = vmatprep.subr.msk.bf16.mxu0 %vm4250_vm5, %v4715_v18  ;;  %vm207_vm5 = vcmp.eq.s32.totalorder %v5019_v13, 4294967279 }
  0x30   :  { %4296 = vmatprep.subr.msk.bf16.mxu1 %vm4295_vm4, %v4715_v18  ;;  %vm478_vm4 = vcmp.eq.s32.totalorder %v5016_v10, 4294967280  ;;  %vm4259_vm8 = vmpackc.low %vm207_vm5, %vm205_vm3  ;;  %vm860_vm3 = vcmp.eq.s32.totalorder %v4785_v11, 4294967281  ;;  %vm5788_vm5 = vcmask 64512  }
  0x31   :  { %vm4304_vm9 = vmpackc.low %vm480_vm6, %vm478_vm4  ;;  %vm862_vm6 = vcmp.eq.s32.totalorder %v4789_v12, 4294967281 }
  0x32   :  { %4252 = vmatpush1.bf16.msra.mxu0 %v4714_v1 }
  0x33   :  { %4297 = vmatpush1.bf16.msra.mxu1 %v4714_v1  ;;  %4254 = vmatprep.subr.msk.bf16.mxu0 %vm4253_vm11, %v4715_v18  ;;  %vm211_vm11 = vcmp.eq.s32.totalorder %v5033_v21, 4294967279 }
  0x34   :  { %4299 = vmatprep.subr.msk.bf16.mxu1 %vm4298_vm12, %v4715_v18  ;;  %vm482_vm12 = vcmp.eq.s32.totalorder %v5030_v16, 4294967280  ;;  %vm4262_vm14 = vmpackc.low %vm211_vm11, %vm209_vm10  ;;  %vm866_vm10 = vcmp.eq.s32.totalorder %v4797_v15, 4294967281  ;;  %vm868_vm11 = vcmp.eq.s32.totalorder %v4804_v17, 4294967281 }
  0x35   :  { %vm4307_vm15 = vmpackc.low %vm484_vm13, %vm482_vm12  ;;  %vm870_vm13 = vcmp.eq.s32.totalorder %v4814_v19, 4294967281 }
  0x36   :  { %4255 = vmatpush1.bf16.msra.mxu0 %v4714_v1  ;;  %vm4317_vm12 = vmpackc.low %vm868_vm11, %vm866_vm10  ;;  %vm882_vm10 = vcmp.eq.s32.totalorder %v4876_v36, 4294967281  ;;  %vm884_vm11 = vcmp.eq.s32.totalorder %v4873_v35, 4294967281 }
  0x37   :  { %4300 = vmatpush1.bf16.msra.mxu1 %v4714_v1  ;;  %4257 = vmatprep.subr.msk.bf16.mxu0 %vm4256_vm1, %v4715_v18  ;;  %vm5074_vm1 = vcmp.ge.s32.totalorder %v132_v24, 1 }
  0x38   :  { %4302 = vmatprep.subr.msk.bf16.mxu1 %vm4301_vm2, %v4715_v18  ;;  %v5800_v33 = vsel %vm5074_vm1, 4294967295, %v5799_v33  ;;  %vm858_vm2 = vcmp.eq.s32.totalorder %v4778_v6, 4294967281 }
  0x39   :  { %vm4311_vm4 = vmpackc.low %vm860_vm3, %vm858_vm2  ;;  %vm874_vm2 = vcmp.eq.s32.totalorder %v4834_v25, 4294967281  ;;  %vm876_vm3 = vcmp.eq.s32.totalorder %v4837_v26, 4294967281 }
  0x3a   :  { %4258 = vmatpush1.bf16.msra.mxu0 %v4714_v1 }
  0x3b   :  { %4303 = vmatpush1.bf16.msra.mxu1 %v4714_v1  ;;  %4260 = vmatprep.subr.msk.bf16.mxu0 %vm4259_vm8, %v4715_v18  ;;  %vm864_vm8 = vcmp.eq.s32.totalorder %v4794_v14, 4294967281 }
  0x3c   :  { %4305 = vmatprep.subr.msk.bf16.mxu1 %vm4304_vm9, %v4715_v18  ;;  %vm4314_vm9 = vmpackc.low %vm864_vm8, %vm862_vm6  ;;  %vm878_vm6 = vcmp.eq.s32.totalorder %v4849_v29, 4294967281  ;;  %vm880_vm8 = vcmp.eq.s32.totalorder %v4852_v30, 4294967281 }
  0x3e   :  { %4261 = vmatpush1.bf16.msra.mxu0 %v4714_v1 }
  0x3f   :  { %4306 = vmatpush1.bf16.msra.mxu1 %v4714_v1  ;;  %4263 = vmatprep.subr.msk.bf16.mxu0 %vm4262_vm14, %v4715_v18  ;;  %vm872_vm14 = vcmp.eq.s32.totalorder %v4819_v20, 4294967281 }
  0x40   :  { %4308 = vmatprep.subr.msk.bf16.mxu1 %vm4307_vm15, %v4715_v18  ;;  %vm4320_vm15 = vmpackc.low %vm872_vm14, %vm870_vm13  ;;  %vm889_vm13 = vcmp.eq.s32.totalorder %v4894_v40, 4294967281 }
  0x41   :  { %vm4329_vm14 = vmpackc.low %vm884_vm11, %vm882_vm10  ;;  %vm897_vm10 = vcmp.eq.s32.totalorder %v4955_v54, 4294967281 }
  0x42   :  { %4264 = vmatpush1.bf16.msra.mxu0 %v4714_v1 }
  0x43   :  { %4309 = vmatpush1.bf16.msra.mxu1 %v4714_v1 }
  0x45   :  { %409 = vmatmul.mubr.f32.vlgmr.msra.gmra.mrb[0].mxu0 %v5057_v22 }
  0x46   :  { %682 = vmatmul.mubr.f32.vlgmr.msra.gmra.mrb[0].mxu1 %v5057_v22  ;;  %845 = vmatprep.mubr.f32.mxu0 %v4717_v45 }
  0x47   :  { %762 = vmatprep.mubr.f32.mxu1 %v4717_v45 }
 0x118   :  { %v410_v31 = vpop.f32.mrb[0].mxu0 }
 0x119   :  { %v683_v39 = vpop.f32.mrb[0].mxu1  ;;  %v412_v42 = vpop.f32.mrb[1].mxu0 }
 0x11a   :  { %v685_v50 = vpop.f32.mrb[1].mxu1  ;;  %3671 = vmatprep.subr.msk.mxu0 %vm5068_vm0, %v412_v42 }
 0x11b   :  { %698 = vmatprep.subr.mxu1 %v685_v50  ;;  %3672 = vmatpush1.msk.msra.mxu0 %vm5074_vm1, %v410_v31 }
 0x11c   :  { %699 = vmatpush1.msra.mxu1 %v683_v39  ;;  %3673 = vmatmul.mubr.msk.f32.vlgmr.msra.gmra.mrb[2].mxu0 %vm5788_vm5, %v423_v43 }
 0x11d   :  { %3669 = vmatmul.mubr.msk.f32.vlgmr.msra.gmra.mrb[2].mxu1 %vm5788_vm5, %v3667_v51  ;;  %4310 = vmatprep.subr.bf16.mxu1 %v4714_v1 }
 0x11e   :  { %4312 = vmatpush1.bf16.msk.msra.mxu1 %vm4311_vm4, %v4715_v18  ;;  %768 = vmatprep.mubr.f32.mxu1 %v4717_v45  ;;  %vm4323_vm4 = vmpackc.low %vm876_vm3, %vm874_vm2  ;;  %vm886_vm2 = vcmp.eq.s32.totalorder %v5128_v58, 4294967281  ;;  %vm891_vm3 = vcmp.eq.s32.totalorder %v4925_v47, 4294967281 }
 0x11f   :  { %4313 = vmatprep.subr.bf16.mxu1 %v4714_v1  ;;  %851 = vmatprep.mubr.f32.mxu0 %v4717_v45 }
 0x120   :  { %3674 = vmatmul.mubr.msk.f32.gmra.mrb[4].mxu0 %vm5788_vm5, %v424_v52  ;;  %4357 = vmatprep.subr.bf16.mxu0 %v4714_v1 }
 0x121   :  { %3670 = vmatmul.mubr.msk.f32.gmra.mrb[4].mxu1 %vm5788_vm5, %v3668_v57  ;;  %1475 = vmatprep.mubr.f32.mxu0 %v4767_v2 }
 0x122   :  { %4315 = vmatpush1.bf16.msk.msra.mxu1 %vm4314_vm9, %v4715_v18  ;;  %1114 = vmatprep.mubr.f32.mxu1 %v4767_v2  ;;  %vm4326_vm9 = vmpackc.low %vm880_vm8, %vm878_vm6 }
 0x123   :  { %4316 = vmatprep.subr.bf16.mxu1 %v4714_v1  ;;  %vm4334_vm6 = vmpackc.low %vm5786_vm7, %vm886_vm2  ;;  %vm905_vm2 = vcmp.eq.s32.totalorder %v4987_v62, 4294967281 }
 0x126   :  { %4318 = vmatpush1.bf16.msk.msra.mxu1 %vm4317_vm12, %v4715_v18  ;;  %vm887_vm12 = vcmp.eq.s32.totalorder %v4883_v37, 4294967281  ;;  %v59_v37 = vadd.s32 240, %v4769_v3 }
 0x127   :  { %4319 = vmatprep.subr.bf16.mxu1 %v4714_v1 }
 0x128   :  { %v5172_v59 = vsub.s32 %v59_v37, %v4843_v28 }
 0x12a   :  { %4321 = vmatpush1.bf16.msk.msra.mxu1 %vm4320_vm15, %v4715_v18  ;;  %vm4331_vm15 = vmpackc.low %vm889_vm13, %vm887_vm12  ;;  %vm899_vm12 = vcmp.eq.s32.totalorder %v4964_v55, 4294967281  ;;  %vm901_vm13 = vcmp.eq.s32.totalorder %v4967_v56, 4294967281 }
 0x12b   :  { %4322 = vmatprep.subr.bf16.mxu1 %v4714_v1 }
 0x12e   :  { %4324 = vmatpush1.bf16.msk.msra.mxu1 %vm4323_vm4, %v4715_v18  ;;  %vm893_vm4 = vcmp.eq.s32.totalorder %v4930_v48, 4294967281 }
 0x12f   :  { %4325 = vmatprep.subr.bf16.mxu1 %v4714_v1  ;;  %vm4336_vm8 = vmpackc.low %vm893_vm4, %vm891_vm3  ;;  %vm907_vm4 = vcmp.eq.s32.totalorder %v4996_v63, 4294967281 }
 0x132   :  { %4327 = vmatpush1.bf16.msk.msra.mxu1 %vm4326_vm9, %v4715_v18  ;;  %vm895_vm9 = vcmp.eq.s32.totalorder %v4952_v53, 4294967281 }
 0x133   :  { %4328 = vmatprep.subr.bf16.mxu1 %v4714_v1  ;;  %vm4339_vm11 = vmpackc.low %vm897_vm10, %vm895_vm9  ;;  %vm911_vm9 = vcmp.eq.s32.totalorder %v5016_v10, 4294967281  ;;  %vm913_vm10 = vcmp.eq.s32.totalorder %v5019_v13, 4294967281 }
 0x136   :  { %4330 = vmatpush1.bf16.msk.msra.mxu1 %vm4329_vm14, %v4715_v18  ;;  %vm4342_vm14 = vmpackc.low %vm901_vm13, %vm899_vm12  ;;  %vm915_vm12 = vcmp.eq.s32.totalorder %v5030_v16, 4294967281  ;;  %vm917_vm13 = vcmp.eq.s32.totalorder %v5033_v21, 4294967281 }
 0x137   :  { %4332 = vmatprep.subr.msk.bf16.mxu1 %vm4331_vm15, %v4715_v18  ;;  %vm903_vm15 = vcmp.eq.s32.totalorder %v4984_v61, 4294967281 }
 0x138   :  { %vm4345_vm3 = vmpackc.low %vm905_vm2, %vm903_vm15  ;;  %vm919_vm15 = vcmp.eq.s32.totalorder %v5172_v59, 4294967281  ;;  %vm1219_vm2 = vcmp.eq.s32.totalorder %v4778_v6, 4294967295 }
 0x13a   :  { %4335 = vmatpush1.bf16.msk.msra.mxu1 %vm4334_vm6, %v5142_v32  ;;  %vm909_vm6 = vcmp.eq.s32.totalorder %v4999_v0, 4294967281 }
 0x13b   :  { %4337 = vmatprep.subr.msk.bf16.mxu1 %vm4336_vm8, %v4715_v18  ;;  %vm4348_vm8 = vmpackc.low %vm909_vm6, %vm907_vm4  ;;  %vm1223_vm6 = vcmp.eq.s32.totalorder %v4789_v12, 4294967295 }
 0x13e   :  { %4338 = vmatpush1.bf16.msra.mxu1 %v4714_v1 }
 0x13f   :  { %4340 = vmatprep.subr.msk.bf16.mxu1 %vm4339_vm11, %v4715_v18  ;;  %vm4351_vm11 = vmpackc.low %vm913_vm10, %vm911_vm9  ;;  %vm1227_vm10 = vcmp.eq.s32.totalorder %v4797_v15, 4294967295 }
 0x142   :  { %4341 = vmatpush1.bf16.msra.mxu1 %v4714_v1 }
 0x143   :  { %4343 = vmatprep.subr.msk.bf16.mxu1 %vm4342_vm14, %v4715_v18  ;;  %vm4354_vm14 = vmpackc.low %vm917_vm13, %vm915_vm12  ;;  %vm1231_vm13 = vcmp.eq.s32.totalorder %v4814_v19, 4294967295 }
 0x146   :  { %4344 = vmatpush1.bf16.msra.mxu1 %v4714_v1 }
 0x147   :  { %4346 = vmatprep.subr.msk.bf16.mxu1 %vm4345_vm3, %v4715_v18  ;;  %vm1221_vm3 = vcmp.eq.s32.totalorder %v4785_v11, 4294967295 }
 0x148   :  { %vm4358_vm4 = vmpackc.low %vm1221_vm3, %vm1219_vm2  ;;  %vm1235_vm2 = vcmp.eq.s32.totalorder %v4834_v25, 4294967295  ;;  %vm1237_vm3 = vcmp.eq.s32.totalorder %v4837_v26, 4294967295 }
 0x149   :  { %4359 = vmatpush1.bf16.msk.msra.mxu0 %vm4358_vm4, %v4715_v18  ;;  %vm4370_vm4 = vmpackc.low %vm1237_vm3, %vm1235_vm2 }
 0x14a   :  { %4347 = vmatpush1.bf16.msra.mxu1 %v4714_v1  ;;  %4360 = vmatprep.subr.bf16.mxu0 %v4714_v1 }
 0x14b   :  { %4349 = vmatprep.subr.msk.bf16.mxu1 %vm4348_vm8, %v4715_v18  ;;  %vm1225_vm8 = vcmp.eq.s32.totalorder %v4794_v14, 4294967295 }
 0x14c   :  { %vm4361_vm9 = vmpackc.low %vm1225_vm8, %vm1223_vm6  ;;  %vm1239_vm6 = vcmp.eq.s32.totalorder %v4849_v29, 4294967295  ;;  %vm1241_vm8 = vcmp.eq.s32.totalorder %v4852_v30, 4294967295 }
 0x14d   :  { %4362 = vmatpush1.bf16.msk.msra.mxu0 %vm4361_vm9, %v4715_v18  ;;  %vm4373_vm9 = vmpackc.low %vm1241_vm8, %vm1239_vm6  ;;  %vm1254_vm6 = vcmp.eq.s32.totalorder %v4930_v48, 4294967295 }
 0x14e   :  { %4350 = vmatpush1.bf16.msra.mxu1 %v4714_v1  ;;  %4363 = vmatprep.subr.bf16.mxu0 %v4714_v1 }
 0x14f   :  { %4352 = vmatprep.subr.msk.bf16.mxu1 %vm4351_vm11, %v4715_v18  ;;  %vm1229_vm11 = vcmp.eq.s32.totalorder %v4804_v17, 4294967295 }
 0x150   :  { %vm4364_vm12 = vmpackc.low %vm1229_vm11, %vm1227_vm10  ;;  %vm1243_vm10 = vcmp.eq.s32.totalorder %v4876_v36, 4294967295  ;;  %vm1245_vm11 = vcmp.eq.s32.totalorder %v4873_v35, 4294967295 }
 0x151   :  { %4365 = vmatpush1.bf16.msk.msra.mxu0 %vm4364_vm12, %v4715_v18  ;;  %vm4376_vm12 = vmpackc.low %vm1245_vm11, %vm1243_vm10  ;;  %vm1258_vm10 = vcmp.eq.s32.totalorder %v4955_v54, 4294967295 }
 0x152   :  { %4353 = vmatpush1.bf16.msra.mxu1 %v4714_v1  ;;  %4366 = vmatprep.subr.bf16.mxu0 %v4714_v1 }
 0x153   :  { %4355 = vmatprep.subr.msk.bf16.mxu1 %vm4354_vm14, %v4715_v18  ;;  %vm1233_vm14 = vcmp.eq.s32.totalorder %v4819_v20, 4294967295 }
 0x156   :  { %4356 = vmatpush1.bf16.msra.mxu1 %v4714_v1 }
 0x157   :  { %3738 = vmatprep.subr.msk.mxu1 %vm919_vm15, %v4716_v44  ;;  %vm4367_vm15 = vmpackc.low %vm1233_vm14, %vm1231_vm13  ;;  %v5207_v44 = vsub.s32 %v4865_v34, %v4771_v4  ;;  %vm1250_vm13 = vcmp.eq.s32.totalorder %v4894_v40, 4294967295  ;;  %v60_v34 = vadd.s32 248, %v4769_v3 }
 0x158   :  { %4368 = vmatpush1.bf16.msk.msra.mxu0 %vm4367_vm15, %v4715_v18  ;;  %vm4379_vm14 = vmpackc.low %vm1250_vm13, %vm5786_vm7  ;;  %vm1247_vm15 = vcmp.eq.s32.totalorder %v5128_v58, 4294967295  ;;  %vm1262_vm13 = vcmp.eq.s32.totalorder %v4967_v56, 4294967295  ;;  %vm1611_vm7 = vcmp.eq.s32.totalorder %v4952_v53, 0 }
 0x159   :  { %4369 = vmatprep.subr.bf16.mxu0 %v4714_v1  ;;  %vm1249_vm2 = vcmp.eq.s32.totalorder %v5207_v44, 4294967295  ;;  %v5248_v40 = vsub.s32 %v60_v34, %v4843_v28  ;;  %v3739_v28 = vld [vmem:[%s5781_s3 + $0x20] sm:$0xff] }
 0x15a   :  { %1111 = vmatpush1.msra.mxu1 %v4717_v45  ;;  %vm4381_vm3 = vmpackc.low %vm1249_vm2, %vm1247_vm15  ;;  %vm1264_vm15 = vcmp.eq.s32.totalorder %v4984_v61, 4294967295  ;;  %vm1266_vm2 = vcmp.eq.s32.totalorder %v4987_v62, 4294967295 }
 0x15b   :  { %1115 = vmatmul.mubr.f32.vlgmr.msra.gmra.mrb[6].mxu1 %v5057_v22 }
 0x15c   :  { %1202 = vmatprep.mubr.f32.mxu1 %v4717_v45  ;;  %4371 = vmatpush1.bf16.msk.msra.mxu0 %vm4370_vm4, %v4715_v18  ;;  %vm1252_vm4 = vcmp.eq.s32.totalorder %v4925_v47, 4294967295 }
 0x15d   :  { %4372 = vmatprep.subr.bf16.mxu0 %v4714_v1  ;;  %vm4383_vm8 = vmpackc.low %vm1254_vm6, %vm1252_vm4  ;;  %vm1268_vm4 = vcmp.eq.s32.totalorder %v4996_v63, 4294967295  ;;  %vm1270_vm6 = vcmp.eq.s32.totalorder %v4999_v0, 4294967295 }
 0x160   :  { %4374 = vmatpush1.bf16.msk.msra.mxu0 %vm4373_vm9, %v4715_v18  ;;  %vm1256_vm9 = vcmp.eq.s32.totalorder %v4952_v53, 4294967295 }
 0x161   :  { %4375 = vmatprep.subr.bf16.mxu0 %v4714_v1  ;;  %vm4386_vm11 = vmpackc.low %vm1258_vm10, %vm1256_vm9  ;;  %vm1272_vm9 = vcmp.eq.s32.totalorder %v5016_v10, 4294967295  ;;  %vm1274_vm10 = vcmp.eq.s32.totalorder %v5019_v13, 4294967295 }
 0x164   :  { %4377 = vmatpush1.bf16.msk.msra.mxu0 %vm4376_vm12, %v4715_v18  ;;  %vm1260_vm12 = vcmp.eq.s32.totalorder %v4964_v55, 4294967295 }
 0x165   :  { %4380 = vmatprep.subr.msk.bf16.mxu0 %vm4379_vm14, %v4912_v46  ;;  %vm4389_vm14 = vmpackc.low %vm1262_vm13, %vm1260_vm12  ;;  %vm1276_vm12 = vcmp.eq.s32.totalorder %v5030_v16, 4294967295  ;;  %vm1278_vm13 = vcmp.eq.s32.totalorder %v5033_v21, 4294967295 }
 0x168   :  { %4382 = vmatpush1.bf16.msk.msra.mxu0 %vm4381_vm3, %v4715_v18  ;;  %vm4392_vm3 = vmpackc.low %vm1266_vm2, %vm1264_vm15  ;;  %vm1280_vm15 = vcmp.eq.s32.totalorder %v5172_v59, 4294967295  ;;  %vm1282_vm2 = vcmp.eq.s32.totalorder %v5248_v40, 4294967295 }
 0x169   :  { %4384 = vmatprep.subr.msk.bf16.mxu0 %vm4383_vm8, %v4715_v18  ;;  %vm4395_vm8 = vmpackc.low %vm1270_vm6, %vm1268_vm4  ;;  %vm5267_vm4 = vcmp.lt.s32.totalorder %v139_v23, 15  ;;  %vm1574_vm6 = vcmp.eq.s32.totalorder %v4778_v6, 0  ;;  %v3740_v23 = vld [vmem:[%s5781_s3 + $0x28] sm:$0xff] }
 0x16c   :  { %4385 = vmatpush1.bf16.msra.mxu0 %v4714_v1 }
 0x16d   :  { %4387 = vmatprep.subr.msk.bf16.mxu0 %vm4386_vm11, %v4715_v18  ;;  %vm4398_vm11 = vmpackc.low %vm1274_vm10, %vm1272_vm9  ;;  %vm5275_vm9 = vcmp.lt.s32.totalorder %v132_v24, 15 }
 0x170   :  { %4388 = vmatpush1.bf16.msra.mxu0 %v4714_v1 }
 0x171   :  { %4390 = vmatprep.subr.msk.bf16.mxu0 %vm4389_vm14, %v4715_v18  ;;  %vm4401_vm14 = vmpackc.low %vm1278_vm13, %vm1276_vm12  ;;  %vm1580_vm12 = vcmp.eq.s32.totalorder %v4794_v14, 0 }
 0x174   :  { %4391 = vmatpush1.bf16.msra.mxu0 %v4714_v1 }
 0x175   :  { %4393 = vmatprep.subr.msk.bf16.mxu0 %vm4392_vm3, %v4715_v18  ;;  %vm4404_vm3 = vmpackc.low %vm1282_vm2, %vm1280_vm15  ;;  %vm1584_vm15 = vcmp.eq.s32.totalorder %v4804_v17, 0 }
 0x178   :  { %4394 = vmatpush1.bf16.msra.mxu0 %v4714_v1 }
 0x179   :  { %4396 = vmatprep.subr.msk.bf16.mxu0 %vm4395_vm8, %v4715_v18  ;;  %vm1576_vm8 = vcmp.eq.s32.totalorder %v4785_v11, 0 }
 0x17a   :  { %vm4408_vm10 = vmpackc.low %vm1576_vm8, %vm1574_vm6  ;;  %vm1588_vm6 = vcmp.eq.s32.totalorder %v4819_v20, 0 }
 0x17c   :  { %4397 = vmatpush1.bf16.msra.mxu0 %v4714_v1 }
 0x17d   :  { %4399 = vmatprep.subr.msk.bf16.mxu0 %vm4398_vm11, %v4715_v18  ;;  %vm1578_vm11 = vcmp.eq.s32.totalorder %v4789_v12, 0 }
 0x17e   :  { %vm4411_vm13 = vmpackc.low %vm1580_vm12, %vm1578_vm11  ;;  %vm1592_vm11 = vcmp.eq.s32.totalorder %v4837_v26, 0 }
 0x180   :  { %4400 = vmatpush1.bf16.msra.mxu0 %v4714_v1 }
 0x181   :  { %4402 = vmatprep.subr.msk.bf16.mxu0 %vm4401_vm14, %v4715_v18  ;;  %vm1582_vm14 = vcmp.eq.s32.totalorder %v4797_v15, 0 }
 0x182   :  { %vm4414_vm2 = vmpackc.low %vm1584_vm15, %vm1582_vm14  ;;  %vm1596_vm14 = vcmp.eq.s32.totalorder %v4852_v30, 0 }
 0x184   :  { %4403 = vmatpush1.bf16.msra.mxu0 %v4714_v1 }
 0x185   :  { %4405 = vmatprep.subr.msk.bf16.mxu0 %vm4404_vm3, %v4715_v18  ;;  %vm1586_vm3 = vcmp.eq.s32.totalorder %v4814_v19, 0 }
 0x186   :  { %vm4417_vm8 = vmpackc.low %vm1588_vm6, %vm1586_vm3  ;;  %vm1600_vm3 = vcmp.eq.s32.totalorder %v4873_v35, 0 }
 0x188   :  { %4406 = vmatpush1.bf16.msra.mxu0 %v4714_v1 }
 0x18b   :  { %1476 = vmatmul.mubr.f32.vlgmr.msra.gmra.mrb[6].mxu0 %v5057_v22 }
 0x18c   :  { %1557 = vmatprep.mubr.f32.mxu0 %v4717_v45 }
 0x1ef   :  { %v847_v3 = vpop.f32.mrb[2].mxu0 }
 0x1f0   :  { %v764_v60 = vpop.f32.mrb[2].mxu1  ;;  %v849_v5 = vpop.f32.mrb[3].mxu0 }
 0x1f1   :  { %v5257_v7 = vadd.f32 %v847_v3, %v764_v60  ;;  %v766_v8 = vpop.f32.mrb[3].mxu1  ;;  %v3811_v60 = vld [vmem:[%s5781_s3 + $0x30] sm:$0xff] }
 0x1f2   :  { %v5259_v9 = vadd.f32 %v849_v5, %v766_v8  ;;  %v3812_v5 = vld [vmem:[%s5781_s3 + $0x38] sm:$0xff]  ;;  %v5409_v8 = vsub.s32 %v4886_v38, %v4771_v4 }
 0x1f3   :  { %v853_v31 = vpop.f32.mrb[4].mxu0 }
 0x1f4   :  { %v770_v39 = vpop.f32.mrb[4].mxu1  ;;  %v855_v42 = vpop.f32.mrb[5].mxu0 }
 0x1f5   :  { %v5261_v43 = vadd.f32 %v853_v31, %v770_v39  ;;  %v772_v50 = vpop.f32.mrb[5].mxu1  ;;  %v5414_v31 = vsub.s32 %v4897_v41, %v4771_v4 }
 0x1f6   :  { %v5263_v51 = vadd.f32 %v855_v42, %v772_v50 }
 0x22e   :  { %v1116_v57 = vpop.f32.mrb[6].mxu1 }
 0x22f   :  { %v1118_v34 = vpop.f32.mrb[7].mxu1 }
 0x230   :  { %3741 = vmatprep.subr.msk.mxu1 %vm5267_vm4, %v1118_v34  ;;  %v3952_v34 = vld [vmem:[%s5781_s3 + $0x58] sm:$0xff] }
 0x231   :  { %3742 = vmatpush1.msk.msra.mxu1 %vm5275_vm9, %v1116_v57 }
 0x232   :  { %3743 = vmatmul.mubr.msk.f32.vlgmr.msra.gmra.mrb[8].mxu1 %vm5788_vm5, %v3739_v28  ;;  %4407 = vmatprep.subr.bf16.mxu1 %v4714_v1 }
 0x233   :  { %4409 = vmatpush1.bf16.msk.msra.mxu1 %vm4408_vm10, %v4715_v18  ;;  %1208 = vmatprep.mubr.f32.mxu1 %v4717_v45  ;;  %vm1590_vm10 = vcmp.eq.s32.totalorder %v4834_v25, 0 }
 0x234   :  { %4410 = vmatprep.subr.bf16.mxu1 %v4714_v1  ;;  %vm4420_vm12 = vmpackc.low %vm1592_vm11, %vm1590_vm10  ;;  %vm1604_vm10 = vcmp.eq.s32.totalorder %v5207_v44, 0  ;;  %vm1607_vm11 = vcmp.eq.s32.totalorder %v4925_v47, 0 }
 0x236   :  { %3744 = vmatmul.mubr.msk.f32.gmra.mrb[10].mxu1 %vm5788_vm5, %v3740_v23  ;;  %vm1617_vm5 = vcmp.eq.s32.totalorder %v4967_v56, 0 }
 0x237   :  { %4412 = vmatpush1.bf16.msk.msra.mxu1 %vm4411_vm13, %v4715_v18  ;;  %1830 = vmatprep.mubr.f32.mxu1 %v4767_v2  ;;  %vm1594_vm13 = vcmp.eq.s32.totalorder %v4849_v29, 0  ;;  %v5360_v2 = vld [vmem:[%s5780_s0 + $0x8] sm:$0xff] }
 0x238   :  { %4413 = vmatprep.subr.bf16.mxu1 %v4714_v1  ;;  %vm4423_vm15 = vmpackc.low %vm1596_vm14, %vm1594_vm13 }
 0x23b   :  { %4415 = vmatpush1.bf16.msk.msra.mxu1 %vm4414_vm2, %v4715_v18  ;;  %vm1598_vm2 = vcmp.eq.s32.totalorder %v4876_v36, 0 }
 0x23c   :  { %4416 = vmatprep.subr.bf16.mxu1 %v4714_v1  ;;  %vm4426_vm6 = vmpackc.low %vm1600_vm3, %vm1598_vm2  ;;  %vm1615_vm3 = vcmp.eq.s32.totalorder %v4964_v55, 0 }
 0x23f   :  { %4418 = vmatpush1.bf16.msk.msra.mxu1 %vm4417_vm8, %v4715_v18  ;;  %vm1602_vm8 = vcmp.eq.s32.totalorder %v5128_v58, 0 }
 0x240   :  { %4419 = vmatprep.subr.bf16.mxu1 %v4714_v1  ;;  %vm4429_vm13 = vmpackc.low %vm1604_vm10, %vm1602_vm8  ;;  %vm1619_vm8 = vcmp.eq.s32.totalorder %v4984_v61, 0  ;;  %vm1621_vm10 = vcmp.eq.s32.totalorder %v4987_v62, 0 }
 0x243   :  { %4421 = vmatpush1.bf16.msk.msra.mxu1 %vm4420_vm12, %v4715_v18  ;;  %vm1609_vm12 = vcmp.eq.s32.totalorder %v4930_v48, 0 }
 0x244   :  { %4422 = vmatprep.subr.bf16.mxu1 %v4714_v1  ;;  %vm4431_vm14 = vmpackc.low %vm1609_vm12, %vm1607_vm11  ;;  %vm1625_vm12 = vcmp.eq.s32.totalorder %v4999_v0, 0 }
 0x245   :  { %vm4440_vm11 = vmpackc.low %vm1621_vm10, %vm1619_vm8  ;;  %vm1635_vm8 = vcmp.eq.s32.totalorder %v5172_v59, 0  ;;  %vm1637_vm10 = vcmp.eq.s32.totalorder %v5248_v40, 0 }
 0x247   :  { %4424 = vmatpush1.bf16.msk.msra.mxu1 %vm4423_vm15, %v4715_v18  ;;  %vm1613_vm15 = vcmp.eq.s32.totalorder %v4955_v54, 0 }
 0x248   :  { %4425 = vmatprep.subr.bf16.mxu1 %v4714_v1  ;;  %vm4434_vm2 = vmpackc.low %vm1613_vm15, %vm1611_vm7  ;;  %vm1623_vm7 = vcmp.eq.s32.totalorder %v4996_v63, 0 }
 0x24b   :  { %4427 = vmatpush1.bf16.msk.msra.mxu1 %vm4426_vm6, %v4715_v18  ;;  %vm4437_vm6 = vmpackc.low %vm1617_vm5, %vm1615_vm3  ;;  %vm1627_vm5 = vcmp.eq.s32.totalorder %v5016_v10, 0  ;;  %vm1633_vm3 = vcmp.eq.s32.totalorder %v5033_v21, 0 }
 0x24c   :  { %4428 = vmatprep.subr.bf16.mxu1 %v4714_v1 }
 0x24f   :  { %4430 = vmatpush1.bf16.msk.msra.mxu1 %vm4429_vm13, %v4715_v18  ;;  %vm4443_vm13 = vmpackc.low %vm1625_vm12, %vm1623_vm7  ;;  %vm5805_vm7 = vcmask 64512  }
 0x250   :  { %4432 = vmatprep.subr.msk.bf16.mxu1 %vm4431_vm14, %v4715_v18  ;;  %vm1629_vm14 = vcmp.eq.s32.totalorder %v5019_v13, 0  ;;  %vm5806_vm12 = vmmov %vm5805_vm7 }
 0x251   :  { %vm4446_vm15 = vmpackc.low %vm1629_vm14, %vm1627_vm5  ;;  %vm5807_vm5 = vmmov 1  }
 0x253   :  { %4433 = vmatpush1.bf16.msra.mxu1 %v4714_v1 }
 0x254   :  { %4435 = vmatprep.subr.msk.bf16.mxu1 %vm4434_vm2, %v4715_v18  ;;  %vm1631_vm2 = vcmp.eq.s32.totalorder %v5030_v16, 0 }
 0x257   :  { %4436 = vmatpush1.bf16.msra.mxu1 %v4714_v1 }
 0x258   :  { %4438 = vmatprep.subr.msk.bf16.mxu1 %vm4437_vm6, %v4715_v18  ;;  %vm4449_vm6 = vmpackc.low %vm1633_vm3, %vm1631_vm2  ;;  %vm2288_vm2 = vcmp.eq.s32.totalorder %v4794_v14, 15 }
 0x25b   :  { %4439 = vmatpush1.bf16.msra.mxu1 %v4714_v1 }
 0x25c   :  { %4441 = vmatprep.subr.msk.bf16.mxu1 %vm4440_vm11, %v4715_v18  ;;  %vm4452_vm11 = vmpackc.low %vm1637_vm10, %vm1635_vm8  ;;  %vm2292_vm8 = vcmp.eq.s32.totalorder %v4804_v17, 15 }
 0x25e   :  { %v1477_v24 = vpop.f32.mrb[6].mxu0 }
 0x25f   :  { %4442 = vmatpush1.bf16.msra.mxu1 %v4714_v1  ;;  %v1479_v3 = vpop.f32.mrb[7].mxu0 }
 0x260   :  { %4444 = vmatprep.subr.msk.bf16.mxu1 %vm4443_vm13, %v4715_v18  ;;  %3813 = vmatprep.subr.msk.mxu0 %vm5068_vm0, %v1479_v3  ;;  %vm2284_vm13 = vcmp.eq.s32.totalorder %v4785_v11, 15  ;;  %vm1968_vm0 = vcmp.eq.s32.totalorder %v4964_v55, 1 }
 0x261   :  { %3814 = vmatpush1.msk.msra.mxu0 %vm5074_vm1, %v1477_v24  ;;  %vm4507_vm14 = vmpackc.low %vm2284_vm13, %vm5807_vm5  ;;  %vm2298_vm13 = vcmp.eq.s32.totalorder %v4834_v25, 15 }
 0x262   :  { %3815 = vmatmul.mubr.msk.f32.vlgmr.msra.gmra.mrb[8].mxu0 %vm5805_vm7, %v3811_v60  ;;  %vm2296_vm7 = vcmp.eq.s32.totalorder %v4819_v20, 15  ;;  %v3440_v60 = vld [vmem:[%s5783_s5] sm:$0xff] }
 0x263   :  { %4445 = vmatpush1.bf16.msra.mxu1 %v4714_v1  ;;  %1563 = vmatprep.mubr.f32.mxu0 %v4717_v45 }
 0x264   :  { %4447 = vmatprep.subr.msk.bf16.mxu1 %vm4446_vm15, %v4715_v18  ;;  %vm2286_vm15 = vcmp.eq.s32.totalorder %v4789_v12, 15 }
 0x265   :  { %vm4510_vm3 = vmpackc.low %vm2288_vm2, %vm2286_vm15  ;;  %vm2302_vm2 = vcmp.eq.s32.totalorder %v4849_v29, 15 }
 0x266   :  { %3816 = vmatmul.mubr.msk.f32.gmra.mrb[10].mxu0 %vm5806_vm12, %v3812_v5  ;;  %v3441_v5 = vld [vmem:[%s5783_s5 + $0x8] sm:$0xff] }
 0x267   :  { %4448 = vmatpush1.bf16.msra.mxu1 %v4714_v1  ;;  %1910 = vmatprep.mubr.f32.mxu0 %v4717_v45 }
 0x268   :  { %4450 = vmatprep.subr.msk.bf16.mxu1 %vm4449_vm6, %v4715_v18  ;;  %vm2290_vm6 = vcmp.eq.s32.totalorder %v4797_v15, 15 }
 0x269   :  { %vm4513_vm10 = vmpackc.low %vm2292_vm8, %vm2290_vm6  ;;  %vm2306_vm8 = vcmp.eq.s32.totalorder %v4876_v36, 15 }
 0x26b   :  { %4451 = vmatpush1.bf16.msra.mxu1 %v4714_v1 }
 0x26c   :  { %4453 = vmatprep.subr.msk.bf16.mxu1 %vm4452_vm11, %v4715_v18  ;;  %vm2294_vm11 = vcmp.eq.s32.totalorder %v4814_v19, 15 }
 0x26d   :  { %vm4516_vm12 = vmpackc.low %vm2296_vm7, %vm2294_vm11  ;;  %vm2310_vm7 = vcmp.eq.s32.totalorder %v5128_v58, 15 }
 0x26f   :  { %4454 = vmatpush1.bf16.msra.mxu1 %v4714_v1 }
 0x270   :  { %4505 = vmatprep.subr.bf16.mxu1 %v4714_v1 }
 0x272   :  { %1831 = vmatmul.mubr.f32.vlgmr.msra.gmra.mrb[12].mxu1 %v5057_v22 }
 0x273   :  { %2538 = vmatprep.mubr.f32.mxu1 %v5360_v2  ;;  %4508 = vmatpush1.bf16.msk.msra.mxu1 %vm4507_vm14, %v4912_v46  ;;  %vm2300_vm14 = vcmp.eq.s32.totalorder %v4837_v26, 15 }
 0x274   :  { %4509 = vmatprep.subr.bf16.mxu1 %v4714_v1  ;;  %vm4519_vm15 = vmpackc.low %vm2300_vm14, %vm2298_vm13  ;;  %vm2317_vm14 = vcmp.eq.s32.totalorder %v4930_v48, 15 }
 0x277   :  { %4511 = vmatpush1.bf16.msk.msra.mxu1 %vm4510_vm3, %v4715_v18  ;;  %vm2304_vm3 = vcmp.eq.s32.totalorder %v4852_v30, 15 }
 0x278   :  { %4512 = vmatprep.subr.bf16.mxu1 %v4714_v1  ;;  %vm4522_vm6 = vmpackc.low %vm2304_vm3, %vm2302_vm2  ;;  %vm2314_vm2 = vcmp.eq.s32.totalorder %v5409_v8, 15  ;;  %vm2316_vm3 = vcmp.eq.s32.totalorder %v5414_v31, 15 }
 0x27b   :  { %4514 = vmatpush1.bf16.msk.msra.mxu1 %vm4513_vm10, %v4715_v18  ;;  %vm2308_vm10 = vcmp.eq.s32.totalorder %v4873_v35, 15 }
 0x27c   :  { %4515 = vmatprep.subr.bf16.mxu1 %v4714_v1  ;;  %vm4525_vm11 = vmpackc.low %vm2308_vm10, %vm2306_vm8  ;;  %vm2319_vm8 = vcmp.eq.s32.totalorder %v4952_v53, 15  ;;  %vm2321_vm10 = vcmp.eq.s32.totalorder %v4955_v54, 15 }
 0x27f   :  { %4517 = vmatpush1.bf16.msk.msra.mxu1 %vm4516_vm12, %v4715_v18  ;;  %vm2312_vm12 = vcmp.eq.s32.totalorder %v5207_v44, 15 }
 0x280   :  { %4518 = vmatprep.subr.bf16.mxu1 %v4714_v1  ;;  %vm4528_vm13 = vmpackc.low %vm2312_vm12, %vm2310_vm7  ;;  %vm2323_vm7 = vcmp.eq.s32.totalorder %v4964_v55, 15  ;;  %vm2325_vm12 = vcmp.eq.s32.totalorder %v4967_v56, 15 }
 0x283   :  { %4520 = vmatpush1.bf16.msk.msra.mxu1 %vm4519_vm15, %v4715_v18  ;;  %vm4531_vm15 = vmpackc.low %vm2317_vm14, %vm5807_vm5  ;;  %vm2327_vm14 = vcmp.eq.s32.totalorder %v4984_v61, 15 }
 0x284   :  { %4521 = vmatprep.subr.bf16.mxu1 %v4714_v1 }
 0x287   :  { %4523 = vmatpush1.bf16.msk.msra.mxu1 %vm4522_vm6, %v4715_v18  ;;  %vm4533_vm6 = vmpackc.low %vm2316_vm3, %vm2314_vm2  ;;  %vm2331_vm3 = vcmp.eq.s32.totalorder %v4996_v63, 15 }
 0x288   :  { %4524 = vmatprep.subr.bf16.mxu1 %v4714_v1 }
 0x28b   :  { %4526 = vmatpush1.bf16.msk.msra.mxu1 %vm4525_vm11, %v4715_v18  ;;  %vm4535_vm11 = vmpackc.low %vm2321_vm10, %vm2319_vm8  ;;  %vm2335_vm10 = vcmp.eq.s32.totalorder %v5016_v10, 15 }
 0x28c   :  { %4527 = vmatprep.subr.bf16.mxu1 %v4714_v1 }
 0x28f   :  { %4529 = vmatpush1.bf16.msk.msra.mxu1 %vm4528_vm13, %v4715_v18  ;;  %vm4538_vm13 = vmpackc.low %vm2325_vm12, %vm2323_vm7  ;;  %vm2339_vm12 = vcmp.eq.s32.totalorder %v5030_v16, 15 }
 0x290   :  { %4532 = vmatprep.subr.msk.bf16.mxu1 %vm4531_vm15, %v4912_v46  ;;  %vm2329_vm15 = vcmp.eq.s32.totalorder %v4987_v62, 15 }
 0x291   :  { %vm4541_vm2 = vmpackc.low %vm2329_vm15, %vm2327_vm14  ;;  %vm2343_vm15 = vcmp.eq.s32.totalorder %v5172_v59, 15 }
 0x293   :  { %4534 = vmatpush1.bf16.msk.msra.mxu1 %vm4533_vm6, %v4715_v18  ;;  %vm2333_vm6 = vcmp.eq.s32.totalorder %v4999_v0, 15 }
 0x294   :  { %4536 = vmatprep.subr.msk.bf16.mxu1 %vm4535_vm11, %v4715_v18  ;;  %vm4544_vm8 = vmpackc.low %vm2333_vm6, %vm2331_vm3  ;;  %vm2337_vm11 = vcmp.eq.s32.totalorder %v5019_v13, 15  ;;  %vm1927_vm6 = vcmp.eq.s32.totalorder %v4778_v6, 1  ;;  %v3882_v6 = vld [vmem:[%s5781_s3 + $0x48] sm:$0xff] }
 0x295   :  { %vm4547_vm7 = vmpackc.low %vm2337_vm11, %vm2335_vm10  ;;  %vm1931_vm11 = vcmp.eq.s32.totalorder %v4789_v12, 1 }
 0x297   :  { %4537 = vmatpush1.bf16.msra.mxu1 %v4714_v1 }
 0x298   :  { %4539 = vmatprep.subr.msk.bf16.mxu1 %vm4538_vm13, %v4715_v18  ;;  %vm2341_vm13 = vcmp.eq.s32.totalorder %v5033_v21, 15 }
 0x299   :  { %vm4550_vm14 = vmpackc.low %vm2341_vm13, %vm2339_vm12  ;;  %vm5808_vm12 = vcmask 64512  }
 0x29b   :  { %4540 = vmatpush1.bf16.msra.mxu1 %v4714_v1 }
 0x29c   :  { %4542 = vmatprep.subr.msk.bf16.mxu1 %vm4541_vm2, %v4715_v18  ;;  %vm2345_vm2 = vcmp.eq.s32.totalorder %v5248_v40, 15 }
 0x29d   :  { %vm4553_vm3 = vmpackc.low %vm2345_vm2, %vm2343_vm15  ;;  %vm1937_vm15 = vcmp.eq.s32.totalorder %v4804_v17, 1 }
 0x29e   :  { %vm5809_vm2 = vmmov %vm5808_vm12 }
 0x29f   :  { %4543 = vmatpush1.bf16.msra.mxu1 %v4714_v1 }
 0x2a0   :  { %4545 = vmatprep.subr.msk.bf16.mxu1 %vm4544_vm8, %v4715_v18  ;;  %vm1929_vm8 = vcmp.eq.s32.totalorder %v4785_v11, 1 }
 0x2a1   :  { %vm4456_vm10 = vmpackc.low %vm1929_vm8, %vm1927_vm6  ;;  %vm1939_vm6 = vcmp.eq.s32.totalorder %v4814_v19, 1  ;;  %vm1941_vm8 = vcmp.eq.s32.totalorder %v4819_v20, 1 }
 0x2a3   :  { %4546 = vmatpush1.bf16.msra.mxu1 %v4714_v1 }
 0x2a4   :  { %4548 = vmatprep.subr.msk.bf16.mxu1 %vm4547_vm7, %v4715_v18  ;;  %vm1933_vm7 = vcmp.eq.s32.totalorder %v4794_v14, 1 }
 0x2a5   :  { %vm4459_vm13 = vmpackc.low %vm1933_vm7, %vm1931_vm11  ;;  %vm1943_vm11 = vcmp.eq.s32.totalorder %v4834_v25, 1  ;;  %vm1945_vm7 = vcmp.eq.s32.totalorder %v4837_v26, 1 }
 0x2a7   :  { %4549 = vmatpush1.bf16.msra.mxu1 %v4714_v1 }
 0x2a8   :  { %4551 = vmatprep.subr.msk.bf16.mxu1 %vm4550_vm14, %v4715_v18  ;;  %vm1935_vm14 = vcmp.eq.s32.totalorder %v4797_v15, 1 }
 0x2ab   :  { %4552 = vmatpush1.bf16.msra.mxu1 %v4714_v1 }
 0x2ac   :  { %4554 = vmatprep.subr.msk.bf16.mxu1 %vm4553_vm3, %v4715_v18  ;;  %vm4462_vm3 = vmpackc.low %vm1937_vm15, %vm1935_vm14  ;;  %vm1949_vm14 = vcmp.eq.s32.totalorder %v4852_v30, 1 }
 0x2af   :  { %4555 = vmatpush1.bf16.msra.mxu1 %v4714_v1 }
 0x2b0   :  { %4603 = vmatprep.subr.bf16.mxu1 %v4714_v1 }
 0x2b2   :  { %2539 = vmatmul.mubr.f32.vlgmr.msra.gmra.mrb[14].mxu1 %v5057_v22 }
 0x2b3   :  { %4604 = vmatpush1.bf16.msra.mxu1 %v4714_v1  ;;  %3246 = vmatprep.mubr.f32.mxu1 %v5360_v2 }
 0x2b4   :  { %4605 = vmatprep.subr.bf16.mxu1 %v4714_v1 }
 0x305   :  { %v1204_v38 = vpop.f32.mrb[8].mxu1 }
 0x306   :  { %v5445_v41 = vadd.f32 %v1204_v38, %v5257_v7  ;;  %v1206_v46 = vpop.f32.mrb[9].mxu1 }
 0x307   :  { %v5449_v39 = vadd.f32 %v1206_v46, %v5259_v9 }
 0x309   :  { %v1210_v42 = vpop.f32.mrb[10].mxu1 }
 0x30a   :  { %v5455_v50 = vadd.f32 %v1210_v42, %v5261_v43  ;;  %v1212_v57 = vpop.f32.mrb[11].mxu1 }
 0x30b   :  { %v5459_v7 = vadd.f32 %v1212_v57, %v5263_v51  ;;  %v3881_v51 = vld [vmem:[%s5781_s3 + $0x40] sm:$0xff]  ;;  %v3445_v57 = vld [vmem:[%s5784_s6 + $0x10] sm:$0xf] }
 0x345   :  { %v1832_v9 = vpop.f32.mrb[12].mxu1 }
 0x346   :  { %v1834_v43 = vpop.f32.mrb[13].mxu1 }
 0x347   :  { %1846 = vmatprep.subr.mxu0 %v1834_v43 }
 0x348   :  { %1847 = vmatpush1.msra.mxu0 %v1832_v9 }
 0x349   :  { %4455 = vmatprep.subr.bf16.mxu0 %v4714_v1  ;;  %3883 = vmatmul.mubr.msk.f32.vlgmr.msra.gmra.mrb[8].mxu0 %vm5808_vm12, %v3881_v51  ;;  %vm4468_vm12 = vmpackc.low %vm1945_vm7, %vm1943_vm11  ;;  %vm1960_vm11 = vcmp.eq.s32.totalorder %v4925_v47, 1  ;;  %vm1962_vm7 = vcmp.eq.s32.totalorder %v4930_v48, 1  ;;  %v100_v48 = vsub.s32 %v4933_v49, %v4771_v4  ;;  %v5615_v4 = vld [vmem:[%s5780_s0] sm:$0xff] }
 0x34a   :  { %4457 = vmatpush1.bf16.msk.msra.mxu0 %vm4456_vm10, %v4715_v18  ;;  %1916 = vmatprep.mubr.f32.mxu0 %v4717_v45  ;;  %vm4465_vm10 = vmpackc.low %vm1941_vm8, %vm1939_vm6  ;;  %vm1955_vm8 = vcmp.eq.s32.totalorder %v5128_v58, 1 }
 0x34b   :  { %4458 = vmatprep.subr.bf16.mxu0 %v4714_v1 }
 0x34d   :  { %3884 = vmatmul.mubr.msk.f32.gmra.mrb[10].mxu0 %vm5809_vm2, %v3882_v6  ;;  %vm1951_vm2 = vcmp.eq.s32.totalorder %v4876_v36, 1 }
 0x34e   :  { %4460 = vmatpush1.bf16.msk.msra.mxu0 %vm4459_vm13, %v4715_v18  ;;  %2183 = vmatprep.mubr.f32.mxu0 %v5360_v2  ;;  %vm1947_vm13 = vcmp.eq.s32.totalorder %v4849_v29, 1 }
 0x34f   :  { %4461 = vmatprep.subr.bf16.mxu0 %v4714_v1  ;;  %vm4471_vm15 = vmpackc.low %vm1949_vm14, %vm1947_vm13  ;;  %vm1959_vm14 = vcmp.eq.s32.totalorder %v5409_v8, 1 }
 0x350   :  { %vm4479_vm13 = vmpackc.low %vm1962_vm7, %vm1960_vm11  ;;  %vm1974_vm11 = vcmp.eq.s32.totalorder %v4987_v62, 1 }
 0x352   :  { %4463 = vmatpush1.bf16.msk.msra.mxu0 %vm4462_vm3, %v4715_v18  ;;  %vm1953_vm3 = vcmp.eq.s32.totalorder %v4873_v35, 1 }
 0x353   :  { %4464 = vmatprep.subr.bf16.mxu0 %v4714_v1  ;;  %vm4474_vm6 = vmpackc.low %vm1953_vm3, %vm1951_vm2  ;;  %vm1966_vm2 = vcmp.eq.s32.totalorder %v4955_v54, 1 }
 0x354   :  { %vm4482_vm3 = vmpackc.low %vm5807_vm5, %vm1959_vm14 }
 0x356   :  { %4466 = vmatpush1.bf16.msk.msra.mxu0 %vm4465_vm10, %v4715_v18  ;;  %vm1957_vm10 = vcmp.eq.s32.totalorder %v5207_v44, 1 }
 0x357   :  { %4467 = vmatprep.subr.bf16.mxu0 %v4714_v1 }
 0x35a   :  { %4469 = vmatpush1.bf16.msk.msra.mxu0 %vm4468_vm12, %v4715_v18  ;;  %vm4477_vm12 = vmpackc.low %vm1957_vm10, %vm1955_vm8  ;;  %vm1972_vm10 = vcmp.eq.s32.totalorder %v4984_v61, 1 }
 0x35b   :  { %4470 = vmatprep.subr.bf16.mxu0 %v4714_v1  ;;  %vm4490_vm7 = vmpackc.low %vm1974_vm11, %vm1972_vm10  ;;  %vm1990_vm10 = vcmp.eq.s32.totalorder %v5248_v40, 1 }
 0x35e   :  { %4472 = vmatpush1.bf16.msk.msra.mxu0 %vm4471_vm15, %v4715_v18  ;;  %vm1964_vm15 = vcmp.eq.s32.totalorder %v4952_v53, 1 }
 0x35f   :  { %4473 = vmatprep.subr.bf16.mxu0 %v4714_v1  ;;  %vm4484_vm1 = vmpackc.low %vm1966_vm2, %vm1964_vm15  ;;  %vm1984_vm2 = vcmp.eq.s32.totalorder %v5030_v16, 1 }
 0x362   :  { %4475 = vmatpush1.bf16.msk.msra.mxu0 %vm4474_vm6, %v4715_v18  ;;  %vm1970_vm6 = vcmp.eq.s32.totalorder %v4967_v56, 1 }
 0x363   :  { %4476 = vmatprep.subr.bf16.mxu0 %v4714_v1  ;;  %vm4487_vm8 = vmpackc.low %vm1970_vm6, %vm1968_vm0  ;;  %vm1980_vm0 = vcmp.eq.s32.totalorder %v5016_v10, 1 }
 0x366   :  { %4478 = vmatpush1.bf16.msk.msra.mxu0 %vm4477_vm12, %v4715_v18  ;;  %vm1976_vm12 = vcmp.eq.s32.totalorder %v4996_v63, 1 }
 0x367   :  { %4480 = vmatprep.subr.msk.bf16.mxu0 %vm4479_vm13, %v4715_v18  ;;  %vm1978_vm13 = vcmp.eq.s32.totalorder %v4999_v0, 1 }
 0x368   :  { %vm4493_vm14 = vmpackc.low %vm1978_vm13, %vm1976_vm12  ;;  %vm2996_vm12 = vcmp.eq.s32.totalorder %v4794_v14, 17 }
 0x36a   :  { %4483 = vmatpush1.bf16.msk.msra.mxu0 %vm4482_vm3, %v5142_v32  ;;  %vm1986_vm3 = vcmp.eq.s32.totalorder %v5033_v21, 1 }
 0x36b   :  { %4485 = vmatprep.subr.msk.bf16.mxu0 %vm4484_vm1, %v4715_v18  ;;  %vm1982_vm1 = vcmp.eq.s32.totalorder %v5019_v13, 1  ;;  %vm4499_vm6 = vmpackc.low %vm1986_vm3, %vm1984_vm2  ;;  %vm3004_vm2 = vcmp.eq.s32.totalorder %v4819_v20, 17 }
 0x36c   :  { %vm4496_vm15 = vmpackc.low %vm1982_vm1, %vm1980_vm0  ;;  %vm3000_vm0 = vcmp.eq.s32.totalorder %v4804_v17, 17 }
 0x36e   :  { %4486 = vmatpush1.bf16.msra.mxu0 %v4714_v1 }
 0x36f   :  { %4488 = vmatprep.subr.msk.bf16.mxu0 %vm4487_vm8, %v4715_v18  ;;  %vm1988_vm8 = vcmp.eq.s32.totalorder %v5172_v59, 1 }
 0x370   :  { %vm4502_vm11 = vmpackc.low %vm1990_vm10, %vm1988_vm8  ;;  %vm3008_vm8 = vcmp.eq.s32.totalorder %v4837_v26, 17 }
 0x372   :  { %4489 = vmatpush1.bf16.msra.mxu0 %v4714_v1 }
 0x373   :  { %4491 = vmatprep.subr.msk.bf16.mxu0 %vm4490_vm7, %v4715_v18  ;;  %vm2994_vm7 = vcmp.eq.s32.totalorder %v4789_v12, 17 }
 0x374   :  { %vm4606_vm13 = vmpackc.low %vm2996_vm12, %vm2994_vm7  ;;  %vm3012_vm7 = vcmp.eq.s32.totalorder %v4852_v30, 17 }
 0x375   :  { %4607 = vmatpush1.bf16.msk.msra.mxu1 %vm4606_vm13, %v4715_v18  ;;  %vm3014_vm13 = vcmp.eq.s32.totalorder %v4876_v36, 17 }
 0x376   :  { %4492 = vmatpush1.bf16.msra.mxu0 %v4714_v1  ;;  %4608 = vmatprep.subr.bf16.mxu1 %v4714_v1 }
 0x377   :  { %4494 = vmatprep.subr.msk.bf16.mxu0 %vm4493_vm14, %v4715_v18  ;;  %vm2998_vm14 = vcmp.eq.s32.totalorder %v4797_v15, 17 }
 0x378   :  { %vm4609_vm1 = vmpackc.low %vm3000_vm0, %vm2998_vm14  ;;  %vm3016_vm14 = vcmp.eq.s32.totalorder %v4873_v35, 17 }
 0x379   :  { %4610 = vmatpush1.bf16.msk.msra.mxu1 %vm4609_vm1, %v4715_v18  ;;  %vm4621_vm0 = vmpackc.low %vm3016_vm14, %vm3014_vm13  ;;  %vm3018_vm1 = vcmp.eq.s32.totalorder %v5128_v58, 17  ;;  %vm3031_vm14 = vcmp.eq.s32.totalorder %v4964_v55, 17 }
 0x37a   :  { %4495 = vmatpush1.bf16.msra.mxu0 %v4714_v1  ;;  %4611 = vmatprep.subr.bf16.mxu1 %v4714_v1 }
 0x37b   :  { %4497 = vmatprep.subr.msk.bf16.mxu0 %vm4496_vm15, %v4715_v18  ;;  %vm3002_vm15 = vcmp.eq.s32.totalorder %v4814_v19, 17 }
 0x37c   :  { %vm4612_vm3 = vmpackc.low %vm3004_vm2, %vm3002_vm15  ;;  %vm3020_vm15 = vcmp.eq.s32.totalorder %v5207_v44, 17 }
 0x37d   :  { %4613 = vmatpush1.bf16.msk.msra.mxu1 %vm4612_vm3, %v4715_v18  ;;  %vm4624_vm2 = vmpackc.low %vm3020_vm15, %vm3018_vm1  ;;  %vm3022_vm3 = vcmp.eq.s32.totalorder %v5409_v8, 17  ;;  %vm3035_vm15 = vcmp.eq.s32.totalorder %v4984_v61, 17 }
 0x37e   :  { %4498 = vmatpush1.bf16.msra.mxu0 %v4714_v1  ;;  %4614 = vmatprep.subr.bf16.mxu1 %v4714_v1 }
 0x37f   :  { %4500 = vmatprep.subr.msk.bf16.mxu0 %vm4499_vm6, %v4715_v18  ;;  %vm3006_vm6 = vcmp.eq.s32.totalorder %v4834_v25, 17 }
 0x380   :  { %vm4615_vm10 = vmpackc.low %vm3008_vm8, %vm3006_vm6  ;;  %vm3024_vm6 = vcmp.eq.s32.totalorder %v5414_v31, 17 }
 0x381   :  { %4616 = vmatpush1.bf16.msk.msra.mxu1 %vm4615_vm10, %v4715_v18  ;;  %vm4627_vm8 = vmpackc.low %vm3024_vm6, %vm3022_vm3  ;;  %vm3027_vm10 = vcmp.eq.s32.totalorder %v4952_v53, 17  ;;  %vm3041_vm6 = vcmp.eq.s32.totalorder %v4999_v0, 17 }
 0x382   :  { %4501 = vmatpush1.bf16.msra.mxu0 %v4714_v1  ;;  %4617 = vmatprep.subr.bf16.mxu1 %v4714_v1 }
 0x383   :  { %4503 = vmatprep.subr.msk.bf16.mxu0 %vm4502_vm11, %v4715_v18  ;;  %vm3010_vm11 = vcmp.eq.s32.totalorder %v4849_v29, 17 }
 0x384   :  { %vm4618_vm12 = vmpackc.low %vm3012_vm7, %vm3010_vm11  ;;  %vm3029_vm11 = vcmp.eq.s32.totalorder %v4955_v54, 17 }
 0x385   :  { %v5545_v11 = vpop.f32.mrb[14].mxu1  ;;  %4619 = vmatpush1.bf16.msk.msra.mxu1 %vm4618_vm12, %v4715_v18  ;;  %vm4629_vm7 = vmpackc.low %vm3029_vm11, %vm3027_vm10  ;;  %vm3026_vm12 = vcmp.eq.s32.totalorder %v100_v48, 17  ;;  %vm3043_vm10 = vcmp.eq.s32.totalorder %v5016_v10, 17  ;;  %vm3045_vm11 = vcmp.eq.s32.totalorder %v5019_v13, 17 }
 0x386   :  { %4504 = vmatpush1.bf16.msra.mxu0 %v4714_v1  ;;  %v5547_v47 = vpop.f32.mrb[15].mxu1  ;;  %4620 = vmatprep.subr.bf16.mxu1 %v4714_v1  ;;  %vm4632_vm13 = vmpackc.low %vm5807_vm5, %vm3026_vm12  ;;  %vm3039_vm5 = vcmp.eq.s32.totalorder %v4996_v63, 17  ;;  %vm3047_vm12 = vcmp.eq.s32.totalorder %v5030_v16, 17 }
 0x389   :  { %2184 = vmatmul.mubr.f32.vlgmr.msra.gmra.mrb[12].mxu0 %v5057_v22  ;;  %4622 = vmatpush1.bf16.msk.msra.mxu1 %vm4621_vm0, %v4715_v18  ;;  %vm3033_vm0 = vcmp.eq.s32.totalorder %v4967_v56, 17 }
 0x38a   :  { %2265 = vmatprep.mubr.f32.mxu0 %v4717_v45  ;;  %4623 = vmatprep.subr.bf16.mxu1 %v4714_v1  ;;  %vm4634_vm1 = vmpackc.low %vm3033_vm0, %vm3031_vm14  ;;  %vm3051_vm0 = vcmp.eq.s32.totalorder %v5172_v59, 17 }
 0x38d   :  { %4625 = vmatpush1.bf16.msk.msra.mxu1 %vm4624_vm2, %v4715_v18  ;;  %vm3037_vm2 = vcmp.eq.s32.totalorder %v4987_v62, 17 }
 0x38e   :  { %4626 = vmatprep.subr.bf16.mxu1 %v4714_v1  ;;  %vm4637_vm3 = vmpackc.low %vm3037_vm2, %vm3035_vm15  ;;  %vm5810_vm2 = vcmask 64512  }
 0x391   :  { %4628 = vmatpush1.bf16.msk.msra.mxu1 %vm4627_vm8, %v4715_v18  ;;  %vm4640_vm8 = vmpackc.low %vm3041_vm6, %vm3039_vm5  ;;  %vm5812_vm5 = vnez %v5800_v33  ;;  %v4022_v33 = vld [vmem:[%s5781_s3 + $0x68] sm:$0xff] }
 0x392   :  { %4630 = vmatprep.subr.msk.bf16.mxu1 %vm4629_vm7, %v4715_v18  ;;  %vm4643_vm7 = vmpackc.low %vm3045_vm11, %vm3043_vm10  ;;  %vm2643_vm10 = vcmp.eq.s32.totalorder %v4794_v14, 16 }
 0x393   :  { %vm5813_vm6 = vmmov %vm5810_vm2 }
 0x394   :  { %vm5814_vm11 = vmmov %vm5810_vm2 }
 0x395   :  { %4633 = vmatpush1.bf16.msk.msra.mxu1 %vm4632_vm13, %v5142_v32  ;;  %vm3049_vm13 = vcmp.eq.s32.totalorder %v5033_v21, 17  ;;  %v3951_v32 = vld [vmem:[%s5781_s3 + $0x50] sm:$0xff] }
 0x396   :  { %4635 = vmatprep.subr.msk.bf16.mxu1 %vm4634_vm1, %v4715_v18  ;;  %vm4646_vm14 = vmpackc.low %vm3049_vm13, %vm3047_vm12  ;;  %vm3053_vm1 = vcmp.eq.s32.totalorder %v5248_v40, 17  ;;  %vm2645_vm12 = vcmp.eq.s32.totalorder %v4797_v15, 16  ;;  %vm2647_vm13 = vcmp.eq.s32.totalorder %v4804_v17, 16  ;;  %v4719_v15 = vmov 0   ;;  %v3345_v17 = vld [vmem:[%s5782_s4] sm:$0xff] }
 0x397   :  { %vm4649_vm15 = vmpackc.low %vm3053_vm1, %vm3051_vm0  ;;  %vm2649_vm1 = vcmp.eq.s32.totalorder %v4814_v19, 16  ;;  %4711 = vset.pattern.permute.xlu0 %v4719_v15  ;;  %v3346_v19 = vld [vmem:[%s5782_s4 + $0x8] sm:$0xff] }
 0x398   :  { %vm4562_vm0 = vmpackc.low %vm2647_vm13, %vm2645_vm12  ;;  %vm2663_vm12 = vcmp.eq.s32.totalorder %v4873_v35, 16  ;;  %3349 = vperm.xlu0 %4711, %v3345_v17  }
 0x399   :  { %4636 = vmatpush1.bf16.msra.mxu1 %v4714_v1 }
 0x39a   :  { %4638 = vmatprep.subr.msk.bf16.mxu1 %vm4637_vm3, %v4715_v18  ;;  %vm5811_vm3 = vnez %v5798_v27  ;;  %v4021_v27 = vld [vmem:[%s5781_s3 + $0x60] sm:$0xff] }
 0x39c   :  { %3354 = vperm.xlu0 %4711, %v3346_v19  }
 0x39d   :  { %4639 = vmatpush1.bf16.msra.mxu1 %v4714_v1 }
 0x39e   :  { %4641 = vmatprep.subr.msk.bf16.mxu1 %vm4640_vm8, %v4715_v18  ;;  %vm2641_vm8 = vcmp.eq.s32.totalorder %v4789_v12, 16 }
 0x3a1   :  { %4642 = vmatpush1.bf16.msra.mxu1 %v4714_v1 }
 0x3a2   :  { %4644 = vmatprep.subr.msk.bf16.mxu1 %vm4643_vm7, %v4715_v18  ;;  %vm4559_vm7 = vmpackc.low %vm2643_vm10, %vm2641_vm8  ;;  %vm2657_vm8 = vcmp.eq.s32.totalorder %v4849_v29, 16  ;;  %vm2659_vm10 = vcmp.eq.s32.totalorder %v4852_v30, 16  ;;  %v4153_v29 = vld [vmem:[%s5781_s3 + $0x80] sm:$0xff]  ;;  %v4154_v30 = vld [vmem:[%s5781_s3 + $0x88] sm:$0xff] }
 0x3a5   :  { %4645 = vmatpush1.bf16.msra.mxu1 %v4714_v1 }
 0x3a6   :  { %4647 = vmatprep.subr.msk.bf16.mxu1 %vm4646_vm14, %v4715_v18  ;;  %vm5815_vm14 = vmmov %vm5810_vm2 }
 0x3a9   :  { %4648 = vmatpush1.bf16.msra.mxu1 %v4714_v1 }
 0x3aa   :  { %4650 = vmatprep.subr.msk.bf16.mxu1 %vm4649_vm15, %v4715_v18  ;;  %vm2651_vm15 = vcmp.eq.s32.totalorder %v4819_v20, 16  ;;  %v4087_v20 = vld [vmem:[%s5781_s3 + $0x70] sm:$0xff] }
 0x3ad   :  { %4651 = vmatpush1.bf16.msra.mxu1 %v4714_v1 }
 0x3ae   :  { %4668 = vmatprep.subr.bf16.mxu1 %v4714_v1 }
 0x3b0   :  { %3247 = vmatmul.mubr.f32.vlgmr.msra.gmra.mrb[16].mxu1 %v5615_v4 }
 0x45c   :  { %v2185_v49 = vpop.f32.mrb[12].mxu0 }
 0x45d   :  { %v2187_v22 = vpop.f32.mrb[13].mxu0 }
 0x45e   :  { %3953 = vmatprep.subr.msk.mxu0 %vm5267_vm4, %v2187_v22 }
 0x45f   :  { %3954 = vmatpush1.msk.msra.mxu0 %vm5275_vm9, %v2185_v49 }
 0x460   :  { %3955 = vmatmul.mubr.msk.f32.vlgmr.msra.gmra.mrb[8].mxu0 %vm5810_vm2, %v3951_v32  ;;  %4023 = vmatprep.subr.msk.mxu0 %vm5811_vm3, %v5547_v47  ;;  %vm4565_vm2 = vmpackc.low %vm2651_vm15, %vm2649_vm1  ;;  %vm2653_vm3 = vcmp.eq.s32.totalorder %v4834_v25, 16  ;;  %vm2669_vm15 = vcmp.eq.s32.totalorder %v5409_v8, 16  ;;  %v4088_v25 = vld [vmem:[%s5781_s3 + $0x78] sm:$0xff]  ;;  %v3442_v8 = vld [vmem:[%s5783_s5 + $0x10] sm:$0xf] }
 0x461   :  { %2271 = vmatprep.mubr.f32.mxu0 %v4717_v45  ;;  %4024 = vmatpush1.msk.msra.mxu0 %vm5812_vm5, %v5545_v11  ;;  %vm2655_vm5 = vcmp.eq.s32.totalorder %v4837_v26, 16  ;;  %v4720_v26 = vmov 0.00390625|0.00390625  }
 0x462   :  { %4556 = vmatprep.subr.bf16.mxu0 %v4714_v1 }
 0x464   :  { %3956 = vmatmul.mubr.msk.f32.gmra.mrb[10].mxu0 %vm5813_vm6, %v3952_v34  ;;  %vm4568_vm6 = vmpackc.low %vm2655_vm5, %vm2653_vm3  ;;  %vm2674_vm3 = vcmp.eq.s32.totalorder %v4952_v53, 16  ;;  %vm2676_vm5 = vcmp.eq.s32.totalorder %v4955_v54, 16 }
 0x465   :  { %2620 = vmatprep.mubr.f32.mxu0 %v4717_v45 }
 0x468   :  { %4025 = vmatmul.mubr.msk.f32.vlgmr.msra.gmra.mrb[8].mxu0 %vm5814_vm11, %v4021_v27  ;;  %vm4571_vm11 = vmpackc.low %vm2659_vm10, %vm2657_vm8  ;;  %vm2678_vm10 = vcmp.eq.s32.totalorder %v4964_v55, 16 }
 0x469   :  { %4557 = vmatpush1.bf16.msra.mxu0 %v4714_v1  ;;  %2626 = vmatprep.mubr.f32.mxu0 %v4717_v45  ;;  %vm4582_vm8 = vmpackc.low %vm2676_vm5, %vm2674_vm3  ;;  %vm2692_vm3 = vcmp.eq.s32.totalorder %v5019_v13, 16 }
 0x46a   :  { %4558 = vmatprep.subr.bf16.mxu0 %v4714_v1 }
 0x46c   :  { %4026 = vmatmul.mubr.msk.f32.gmra.mrb[10].mxu0 %vm5815_vm14, %v4022_v33  ;;  %vm2665_vm14 = vcmp.eq.s32.totalorder %v5128_v58, 16 }
 0x46d   :  { %4560 = vmatpush1.bf16.msk.msra.mxu0 %vm4559_vm7, %v4715_v18  ;;  %2893 = vmatprep.mubr.f32.mxu0 %v5360_v2  ;;  %vm2661_vm7 = vcmp.eq.s32.totalorder %v4876_v36, 16  ;;  %v3350_v36 = vpop.permute.xlu0 %3349 }
 0x46e   :  { %4561 = vmatprep.subr.bf16.mxu0 %v4714_v1  ;;  %vm4574_vm13 = vmpackc.low %vm2663_vm12, %vm2661_vm7  ;;  %vm2682_vm12 = vcmp.eq.s32.totalorder %v4984_v61, 16 }
 0x471   :  { %4563 = vmatpush1.bf16.msk.msra.mxu0 %vm4562_vm0, %v4715_v18  ;;  %vm2667_vm0 = vcmp.eq.s32.totalorder %v5207_v44, 16 }
 0x472   :  { %4564 = vmatprep.subr.bf16.mxu0 %v4714_v1  ;;  %vm4577_vm1 = vmpackc.low %vm2667_vm0, %vm2665_vm14  ;;  %vm2686_vm0 = vcmp.eq.s32.totalorder %v4996_v63, 16 }
 0x475   :  { %4566 = vmatpush1.bf16.msk.msra.mxu0 %vm4565_vm2, %v4715_v18  ;;  %vm2671_vm2 = vcmp.eq.s32.totalorder %v5414_v31, 16  ;;  %v3443_v31 = vld [vmem:[%s5784_s6] sm:$0xff] }
 0x476   :  { %4567 = vmatprep.subr.bf16.mxu0 %v4714_v1 }
 0x479   :  { %4569 = vmatpush1.bf16.msk.msra.mxu0 %vm4568_vm6, %v4715_v18  ;;  %vm4580_vm6 = vmpackc.low %vm2671_vm2, %vm2669_vm15  ;;  %vm2690_vm2 = vcmp.eq.s32.totalorder %v5016_v10, 16 }
 0x47a   :  { %4570 = vmatprep.subr.bf16.mxu0 %v4714_v1  ;;  %vm4594_vm5 = vmpackc.low %vm2692_vm3, %vm2690_vm2  ;;  %vm3539_vm2 = vcmask 3072  }
 0x47d   :  { %4572 = vmatpush1.bf16.msk.msra.mxu0 %vm4571_vm11, %v4715_v18  ;;  %vm2680_vm11 = vcmp.eq.s32.totalorder %v4967_v56, 16 }
 0x47e   :  { %4573 = vmatprep.subr.bf16.mxu0 %v4714_v1  ;;  %vm4585_vm7 = vmpackc.low %vm2680_vm11, %vm2678_vm10  ;;  %vm2698_vm11 = vcmp.eq.s32.totalorder %v5172_v59, 16 }
 0x481   :  { %4575 = vmatpush1.bf16.msk.msra.mxu0 %vm4574_vm13, %v4715_v18  ;;  %vm2684_vm13 = vcmp.eq.s32.totalorder %v4987_v62, 16 }
 0x482   :  { %4576 = vmatprep.subr.bf16.mxu0 %v4714_v1  ;;  %vm4588_vm14 = vmpackc.low %vm2684_vm13, %vm2682_vm12  ;;  %vm5816_vm13 = vcmask 64512  }
 0x483   :  { %v3248_v12 = vpop.f32.mrb[16].mxu1 }
 0x484   :  { %v3250_v14 = vpop.f32.mrb[17].mxu1 }
 0x485   :  { %4578 = vmatpush1.bf16.msk.msra.mxu0 %vm4577_vm1, %v4715_v18  ;;  %vm2688_vm1 = vcmp.eq.s32.totalorder %v4999_v0, 16 }
 0x486   :  { %4579 = vmatprep.subr.bf16.mxu0 %v4714_v1  ;;  %vm4591_vm15 = vmpackc.low %vm2688_vm1, %vm2686_vm0  ;;  %vm4721_vm0 = vmmov 0   ;;  %vm3446_vm1 = vcmask 130048  }
 0x487   :  { %4209 = vmatprep.mubr.msk.f32.mxu1 %vm4721_vm0, %v4717_v45 }
 0x489   :  { %4581 = vmatpush1.bf16.msk.msra.mxu0 %vm4580_vm6, %v4715_v18  ;;  %vm2694_vm6 = vcmp.eq.s32.totalorder %v5030_v16, 16  ;;  %v3355_v16 = vpop.permute.xlu0 %3354 }
 0x48a   :  { %4583 = vmatprep.subr.msk.bf16.mxu0 %vm4582_vm8, %v4715_v18  ;;  %vm2696_vm8 = vcmp.eq.s32.totalorder %v5033_v21, 16 }
 0x48b   :  { %vm4597_vm10 = vmpackc.low %vm2696_vm8, %vm2694_vm6 }
 0x48d   :  { %4584 = vmatpush1.bf16.msra.mxu0 %v4714_v1 }
 0x48e   :  { %4586 = vmatprep.subr.msk.bf16.mxu0 %vm4585_vm7, %v4715_v18  ;;  %vm2700_vm7 = vcmp.eq.s32.totalorder %v5248_v40, 16 }
 0x48f   :  { %vm4600_vm12 = vmpackc.low %vm2700_vm7, %vm2698_vm11 }
 0x491   :  { %4587 = vmatpush1.bf16.msra.mxu0 %v4714_v1 }
 0x492   :  { %4589 = vmatprep.subr.msk.bf16.mxu0 %vm4588_vm14, %v4715_v18  ;;  %vm5817_vm14 = vmmov %vm5816_vm13 }
 0x495   :  { %4590 = vmatpush1.bf16.msra.mxu0 %v4714_v1 }
 0x496   :  { %4592 = vmatprep.subr.msk.bf16.mxu0 %vm4591_vm15, %v4715_v18  ;;  %vm3536_vm15 = vcmask 7168  }
 0x499   :  { %4593 = vmatpush1.bf16.msra.mxu0 %v4714_v1 }
 0x49a   :  { %4595 = vmatprep.subr.msk.bf16.mxu0 %vm4594_vm5, %v4715_v18 }
 0x49d   :  { %4596 = vmatpush1.bf16.msra.mxu0 %v4714_v1 }
 0x49e   :  { %4598 = vmatprep.subr.msk.bf16.mxu0 %vm4597_vm10, %v4715_v18 }
 0x4a1   :  { %4599 = vmatpush1.bf16.msra.mxu0 %v4714_v1 }
 0x4a2   :  { %4601 = vmatprep.subr.msk.bf16.mxu0 %vm4600_vm12, %v4715_v18 }
 0x4a5   :  { %4602 = vmatpush1.bf16.msra.mxu0 %v4714_v1 }
 0x4a8   :  { %2894 = vmatmul.mubr.f32.vlgmr.msra.gmra.mrb[14].mxu0 %v5615_v4 }
 0x4a9   :  { %2973 = vmatprep.mubr.f32.mxu0 %v4717_v45 }
 0x57b   :  { %v2895_v18 = vpop.f32.mrb[14].mxu0 }
 0x57c   :  { %v2897_v1 = vpop.f32.mrb[15].mxu0 }
 0x57d   :  { %2909 = vmatprep.subr.mxu0 %v2897_v1 }
 0x57e   :  { %2910 = vmatpush1.msra.mxu0 %v2895_v18 }
 0x57f   :  { %4089 = vmatmul.mubr.msk.f32.vlgmr.msra.gmra.mrb[8].mxu0 %vm5816_vm13, %v4087_v20  ;;  %4155 = vmatprep.subr.msk.mxu0 %vm5267_vm4, %v3250_v14  ;;  %vm5818_vm4 = vmmov %vm5816_vm13 }
 0x580   :  { %2979 = vmatprep.mubr.f32.mxu0 %v4717_v45  ;;  %4156 = vmatpush1.msk.msra.mxu0 %vm5275_vm9, %v3248_v12  ;;  %vm5819_vm9 = vmmov %vm5818_vm4 }
 0x581   :  { %4652 = vmatprep.subr.bf16.mxu0 %v4720_v26 }
 0x583   :  { %4090 = vmatmul.mubr.msk.f32.gmra.mrb[10].mxu0 %vm5817_vm14, %v4088_v25 }
 0x584   :  { %3328 = vmatprep.mubr.f32.mxu0 %v4717_v45 }
 0x587   :  { %4157 = vmatmul.mubr.msk.f32.vlgmr.msra.gmra.mrb[8].mxu0 %vm5818_vm4, %v4153_v29 }
 0x588   :  { %3334 = vmatprep.mubr.f32.mxu0 %v4717_v45  ;;  %4653 = vmatpush3.bf16.msra.mxu0 %v4720_v26 }
 0x589   :  { %4654 = vmatprep.subr.bf16.mxu0 %v4720_v26 }
 0x58b   :  { %4158 = vmatmul.mubr.msk.f32.gmra.mrb[10].mxu0 %vm5819_vm9, %v4154_v30 }
 0x58c   :  { %4655 = vmatpush3.bf16.msra.mxu0 %v4720_v26 }
 0x58d   :  { %4656 = vmatprep.subr.bf16.mxu0 %v4720_v26 }
 0x590   :  { %4657 = vmatpush3.bf16.msra.mxu0 %v4720_v26 }
 0x591   :  { %4658 = vmatprep.subr.bf16.mxu0 %v4720_v26 }
 0x594   :  { %4659 = vmatpush3.bf16.msra.mxu0 %v4720_v26 }
 0x595   :  { %4660 = vmatprep.subr.bf16.mxu0 %v4720_v26 }
 0x598   :  { %4661 = vmatpush3.bf16.msra.mxu0 %v4720_v26 }
 0x599   :  { %4662 = vmatprep.subr.bf16.mxu0 %v4720_v26 }
 0x59c   :  { %4663 = vmatpush3.bf16.msra.mxu0 %v4720_v26 }
 0x59d   :  { %4664 = vmatprep.subr.bf16.mxu0 %v4720_v26 }
 0x5a0   :  { %4665 = vmatpush3.bf16.msra.mxu0 %v4720_v26 }
 0x5a1   :  { %4666 = vmatprep.subr.bf16.mxu0 %v4720_v26 }
 0x5a4   :  { %4667 = vmatpush3.bf16.msra.mxu0 %v4720_v26 }
 0x65a   :  { %v3330_v35 = vpop.f32.mrb[8].mxu0 }
 0x65b   :  { %v4673_v53 = vadd.f32 %v3330_v35, %v5445_v41  ;;  %v3332_v54 = vpop.f32.mrb[9].mxu0 }
 0x65c   :  { %v4676_v55 = vadd.f32 %v3332_v54, %v5449_v39  ;;  %v3444_v39 = vld [vmem:[%s5784_s6 + $0x8] sm:$0xff] }
 0x65d   :  { %v3357_v56 = vadd.f32 %v4673_v53, %v3350_v36 }
 0x65e   :  { %v3358_v61 = vadd.f32 %v4676_v55, %v3350_v36  ;;  %v3336_v62 = vpop.f32.mrb[10].mxu0 }
 0x65f   :  { %v4679_v63 = vadd.f32 %v3336_v62, %v5455_v50  ;;  %v3338_v0 = vpop.f32.mrb[11].mxu0  ;;  %v3361_v21 = vmax.f32 %v3357_v56, 0.0 }
 0x660   :  { %v3362_v10 = vmax.f32 %v3358_v61, 0.0  ;;  %v4682_v13 = vadd.f32 %v3338_v0, %v5459_v7 }
 0x661   :  { %v3359_v58 = vadd.f32 %v4679_v63, %v3355_v16 }
 0x662   :  { %v3360_v59 = vadd.f32 %v4682_v13, %v3355_v16  ;;  %3429 = vmatprep.mubr.f32.mxu0 %v3362_v10 }
 0x663   :  { %3430 = vmatmul.mubr.f32.vlgmr.msra.gmra.mrb[16].mxu0 %v3361_v21  ;;  %v3363_v40 = vmax.f32 %v3359_v58, 0.0 }
 0x664   :  { %v3364_v44 = vmax.f32 %v3360_v59, 0.0 }
 0x666   :  { %3434 = vmatprep.mubr.f32.mxu0 %v3364_v44 }
 0x667   :  { %3435 = vmatmul.mubr.f32.gmra.mrb[18].mxu0 %v3363_v40 }
 0x736   :  { %v4194_v52 = vpop.f32.mrb[16].mxu0 }
 0x737   :  { %v4195_v37 = vpop.f32.mrb[17].mxu0 }
 0x738   :  { %v4196_v28 = vadd.f32 %v4195_v37, %v4194_v52 }
 0x73a   :  { %v4197_v23 = vpop.f32.mrb[18].mxu0 }
 0x73b   :  { %v4198_v2 = vpop.f32.mrb[19].mxu0 }
 0x73c   :  { %v4199_v24 = vadd.f32 %v4198_v2, %v4197_v23 }
 0x73e   :  { %v4669_v3 = vpack.c.bf16 %v4199_v24, %v4196_v28 }
 0x740   :  { %4670 = vmatpush3.bf16.msra.mxu1 %v4669_v3 }
 0x743   :  { %4210 = vmatmul.mubr.msk.f32.vlgmr.msra.gmra.mrb[18].mxu1 %vm3446_vm1, %v3440_v60 }
 0x744   :  { %4212 = vmatprep.mubr.msk.f32.mxu1 %vm4721_vm0, %v4717_v45 }
 0x747   :  { %4213 = vmatmul.mubr.msk.f32.gmra.mrb[20].mxu1 %vm3446_vm1, %v3441_v5 }
 0x748   :  { %4215 = vmatprep.mubr.msk.f32.mxu1 %vm4721_vm0, %v4717_v45 }
 0x74b   :  { %4216 = vmatmul.mubr.msk.f32.gmra.mrb[22].mxu1 %vm3446_vm1, %v3442_v8 }
 0x816   :  { %v3522_v38 = vpop.f32.mrb[18].mxu1 }
 0x817   :  { %v3523_v41 = vadd.f32 %v3522_v38, %v3443_v31  ;;  %v4211_v46 = vpop.f32.mrb[19].mxu1 }
 0x819   :  { %3537 = vst.msk [vmem:[%s5785_s7] sm:$0xff] %vm3536_vm15, %v3523_v41 }
 0x81a   :  { %v3527_v45 = vpop.f32.mrb[20].mxu1 }
 0x81b   :  { %v3528_v42 = vadd.f32 %v3527_v45, %v3444_v39  ;;  %v4214_v50 = vpop.f32.mrb[21].mxu1 }
 0x81d   :  { %3538 = vst.msk [vmem:[%s5785_s7 + $0x8] sm:$0xff] %vm3536_vm15, %v3528_v42 }
 0x81e   :  { %v3532_v7 = vpop.f32.mrb[22].mxu1 }
 0x81f   :  { %v3533_v9 = vadd.f32 %v3532_v7, %v3445_v57  ;;  %v4217_v43 = vpop.f32.mrb[23].mxu1 }
 0x821   :  { %3540 = vst.msk [vmem:[%s5785_s7 + $0x10] sm:$0xf] %vm3539_vm2, %v3533_v9 }

</bundles_post_ra>
